<compile_context>
chip_gen: v5e
topology: v5e:2x2
jax: 0.10.0
libtpu: 0.0.40
codegen_flags: <defaults>
</compile_context>

<pallas_src>
import functools

import jax
import jax.numpy as jnp
from jax.experimental import pallas as pl
from jax.experimental.pallas import tpu as pltpu


def _channel_attn_kernel(x_ref, p_avg_ref, p_max_ref, expand_ref, w1t_ref, w2t_ref,
                         o_ref, *, pool_w):
    """x_ref/o_ref: (TM, K*W) lane-dense tiles; constants built in the wrapper."""
    f32 = jnp.float32
    hi = jax.lax.Precision.HIGHEST

    x = x_ref[...]                      # (TM, K*W), kept in native dtype
    tm = x.shape[0]

    # ---- average pool over W: block-diagonal 1/W matmul on the MXU (f32 accumulate) --
    avg_x = jnp.dot(x, p_avg_ref[...], precision=hi,
                    preferred_element_type=f32)                      # (TM, K)

    # ---- max pool over W: lane-roll tree (XLU) + 0/1 selection matmul (MXU) ----------
    # Invariant: after covering c lanes, y[:, i] = max(x[:, i-c+1 : i+1]).  After the
    # loop, lane k*W + (W-1) holds the max over lanes [k*W, k*W + W - 1] (no wrap there).
    y = x
    covered = 1
    while covered < pool_w:
        shift = min(covered, pool_w - covered)
        y = jnp.maximum(y, pltpu.roll(y, shift, axis=1))
        covered += shift
    max_x = jnp.dot(y, p_max_ref[...], precision=hi,
                    preferred_element_type=f32)                      # (TM, K)

    # ---- fused FC: run avg rows and max rows through one matmul chain ----------------
    pooled = jnp.concatenate([avg_x, max_x], axis=0)                 # (2*TM, K)
    h = jnp.maximum(
        jnp.dot(pooled, w1t_ref[...], precision=hi, preferred_element_type=f32), 0.0)
    z = jnp.dot(h, w2t_ref[...], precision=hi,
                preferred_element_type=f32)                          # (2*TM, K)
    v = jax.nn.sigmoid(z[:tm] + z[tm:])                              # (TM, K)

    # ---- expand v to (TM, K*W) (each channel repeated W times) and scale lane-dense --
    v_kw = jnp.dot(v, expand_ref[...].astype(f32), precision=hi,
                   preferred_element_type=f32)                       # (TM, K*W)
    o_ref[...] = (x * v_kw.astype(x.dtype)).astype(o_ref.dtype)


def channel_attention_fc(x, w1, w2, *, tile_m=None):
    """x: (B, N, K, W); w1: (H, K), w2: (K, H) in PyTorch Linear (out, in) layout."""
    B, N, K, W = x.shape
    M = B * N
    KW = K * W
    itemsize = jnp.dtype(x.dtype).itemsize

    # ---- tile_m from a VMEM budget: ~8 MiB for the double-buffered x in/out tiles ----
    # (total kernel VMEM stays well under the 32 MiB scoped limit on v5e/v6e/v7x).
    if tile_m is None:
        budget_bytes = 8 << 20
        tile_m = budget_bytes // (4 * KW * itemsize)
        tile_m = max(8, min((tile_m // 8) * 8, 2048))
    tile_m = max(8, (tile_m // 8) * 8)

    m_pad = pl.cdiv(M, 8) * 8                    # sublane-align the row count
    tile_m = min(tile_m, m_pad)
    # Prefer >= 2 grid steps so DMA pipelining / megacore sharding can engage.
    if m_pad > 8 and m_pad <= tile_m:
        tile_m = pl.cdiv(pl.cdiv(m_pad, 2), 8) * 8
    grid_m = pl.cdiv(m_pad, tile_m)
    m_pad = grid_m * tile_m

    # ---- lane-dense input (free contiguous reshape) + pad rows to a tile multiple ----
    xf = x.reshape(M, KW)
    if m_pad != M:
        xf = jnp.pad(xf, ((0, m_pad - M), (0, 0)))

    # ---- tiny constant matrices (pooling / selection / expansion), built host-side ---
    lane = jnp.arange(KW, dtype=jnp.int32)
    ch = lane // W                                # channel id of each flattened lane
    cols = jnp.arange(K, dtype=jnp.int32)
    p_avg = ((ch[:, None] == cols[None, :]).astype(jnp.float32) / W).astype(x.dtype)
    p_max = (lane[:, None] == (cols[None, :] * W + (W - 1))).astype(x.dtype)  # (KW, K)
    expand = (cols[:, None] == ch[None, :]).astype(x.dtype)                   # (K, KW)

    w1t = jnp.asarray(w1, jnp.float32).T          # (K, H)
    w2t = jnp.asarray(w2, jnp.float32).T          # (H, K)
    H = w1t.shape[1]

    kernel = functools.partial(_channel_attn_kernel, pool_w=W)

    flops = (4 * m_pad * KW * K                   # avg + max-select matmuls
             + 4 * (2 * m_pad) * K * H            # fused two-layer FC
             + 2 * m_pad * K * KW                 # expansion matmul
             + m_pad * KW)                        # final scale
    cost = pl.CostEstimate(
        flops=int(flops),
        transcendentals=int(m_pad * K),
        bytes_accessed=int(2 * m_pad * KW * itemsize),
    )

    out = pl.pallas_call(
        kernel,
        out_shape=jax.ShapeDtypeStruct((m_pad, KW), x.dtype),
        grid_spec=pltpu.PrefetchScalarGridSpec(
            num_scalar_prefetch=0,
            grid=(grid_m,),
            in_specs=[
                pl.BlockSpec((tile_m, KW), lambda i: (i, 0)),   # x, lane-dense
                pl.BlockSpec((KW, K), lambda i: (0, 0)),        # p_avg
                pl.BlockSpec((KW, K), lambda i: (0, 0)),        # p_max
                pl.BlockSpec((K, KW), lambda i: (0, 0)),        # expand
                pl.BlockSpec((K, H), lambda i: (0, 0)),         # w1^T
                pl.BlockSpec((H, K), lambda i: (0, 0)),         # w2^T
            ],
            out_specs=pl.BlockSpec((tile_m, KW), lambda i: (i, 0)),
        ),
        compiler_params=pltpu.CompilerParams(
            dimension_semantics=("parallel",),
            vmem_limit_bytes=32 * 1024 * 1024,
        ),
        cost_estimate=cost,
    )(xf, p_avg, p_max, expand, w1t, w2t)

    if m_pad != M:
        out = out[:M]
    return out.reshape(B, N, K, W)


def _reference(x, w1, w2):
    hi = jax.lax.Precision.HIGHEST
    avg_x = jnp.mean(x, axis=-1)
    max_x = jnp.max(x, axis=-1)

    def fc(v):
        h = jnp.maximum(jnp.dot(v, w1.T, precision=hi), 0.0)
        return jnp.dot(h, w2.T, precision=hi)

    v = jax.nn.sigmoid(fc(avg_x) + fc(max_x))
    return x * v[..., None]


if __name__ == "__main__":
    B, N, K_IMP, W = 2, 4, 16, 16   # x is (B, N, K_IMP, W); ratio = 1
    ratio = 1
    H = K_IMP // ratio

    key = jax.random.PRNGKey(0)
    kx, k1, k2 = jax.random.split(key, 3)
    x = jax.random.normal(kx, (B, N, K_IMP, W), dtype=jnp.float32)
    # PyTorch Linear layout: (out_features, in_features), no bias.
    w1 = jax.random.normal(k1, (H, K_IMP), dtype=jnp.float32) * 0.1
    w2 = jax.random.normal(k2, (K_IMP, H), dtype=jnp.float32) * 0.1

    out = channel_attention_fc(x, w1, w2)
    out = jax.block_until_ready(out)

    ref = _reference(x, w1, w2)
    assert out.shape == (B, N, K_IMP, W)
    assert jnp.allclose(out, ref, atol=1e-5, rtol=1e-5), "mismatch vs reference"

    print("KERNEL_OK")
</pallas_src>

<mosaic_0001>
module attributes {stable_mosaic.version = 11 : i64} {
  func.func @_channel_attn_kernel(%arg0: i32, %arg1: memref<8x256xf32, #tpu.memory_space<vmem>>, %arg2: memref<256x16xf32, #tpu.memory_space<vmem>>, %arg3: memref<256x16xf32, #tpu.memory_space<vmem>>, %arg4: memref<16x256xf32, #tpu.memory_space<vmem>>, %arg5: memref<16x16xf32, #tpu.memory_space<vmem>>, %arg6: memref<16x16xf32, #tpu.memory_space<vmem>>, %arg7: memref<8x256xf32, #tpu.memory_space<vmem>>) attributes {dimension_semantics = [#tpu.dimension_semantics<parallel>], iteration_bounds = array<i64: 1>, scalar_prefetch = 0 : i64, scratch_operands = 0 : i64, tpu.core_type = #tpu.core_type<tc>, window_params = [{transform_indices = @transform_0, window_bounds = array<i64: 8, 256>}, {pipeline_mode = #tpu.pipeline_mode<synchronous>, transform_indices = @transform_1, window_bounds = array<i64: 256, 16>}, {pipeline_mode = #tpu.pipeline_mode<synchronous>, transform_indices = @transform_2, window_bounds = array<i64: 256, 16>}, {pipeline_mode = #tpu.pipeline_mode<synchronous>, transform_indices = @transform_3, window_bounds = array<i64: 16, 256>}, {pipeline_mode = #tpu.pipeline_mode<synchronous>, transform_indices = @transform_4, window_bounds = array<i64: 16, 16>}, {pipeline_mode = #tpu.pipeline_mode<synchronous>, transform_indices = @transform_5, window_bounds = array<i64: 16, 16>}, {transform_indices = @transform_6, window_bounds = array<i64: 8, 256>}]} {
    %c0 = arith.constant 0 : index
    %c0_0 = arith.constant 0 : index
    %0 = vector.load %arg1[%c0, %c0_0] : memref<8x256xf32, #tpu.memory_space<vmem>>, vector<8x256xf32>
    %c0_1 = arith.constant 0 : index
    %c0_2 = arith.constant 0 : index
    %1 = vector.load %arg2[%c0_1, %c0_2] : memref<256x16xf32, #tpu.memory_space<vmem>>, vector<256x16xf32>
    %cst = arith.constant dense<0.000000e+00> : vector<8x16xf32>
    %2 = tpu.matmul %0, %1, %cst {dimension_numbers = #tpu.dot_dimension_numbers<[1], [0], [0], [1], [0, 0, 1, 1], [], []>, precision = #tpu.contract_precision<fp32>} : vector<8x256xf32>, vector<256x16xf32>, vector<8x16xf32> -> vector<8x16xf32>
    %c1_i32 = arith.constant 1 : i32
    %3 = tpu.dynamic_rotate %0 by %c1_i32 dim 1 : vector<8x256xf32>, i32 -> vector<8x256xf32>
    %4 = arith.maximumf %0, %3 : vector<8x256xf32>
    %c2_i32 = arith.constant 2 : i32
    %5 = tpu.dynamic_rotate %4 by %c2_i32 dim 1 : vector<8x256xf32>, i32 -> vector<8x256xf32>
    %6 = arith.maximumf %4, %5 : vector<8x256xf32>
    %c4_i32 = arith.constant 4 : i32
    %7 = tpu.dynamic_rotate %6 by %c4_i32 dim 1 : vector<8x256xf32>, i32 -> vector<8x256xf32>
    %8 = arith.maximumf %6, %7 : vector<8x256xf32>
    %c8_i32 = arith.constant 8 : i32
    %9 = tpu.dynamic_rotate %8 by %c8_i32 dim 1 : vector<8x256xf32>, i32 -> vector<8x256xf32>
    %10 = arith.maximumf %8, %9 : vector<8x256xf32>
    %c0_3 = arith.constant 0 : index
    %c0_4 = arith.constant 0 : index
    %11 = vector.load %arg3[%c0_3, %c0_4] : memref<256x16xf32, #tpu.memory_space<vmem>>, vector<256x16xf32>
    %cst_5 = arith.constant dense<0.000000e+00> : vector<8x16xf32>
    %12 = tpu.matmul %10, %11, %cst_5 {dimension_numbers = #tpu.dot_dimension_numbers<[1], [0], [0], [1], [0, 0, 1, 1], [], []>, precision = #tpu.contract_precision<fp32>} : vector<8x256xf32>, vector<256x16xf32>, vector<8x16xf32> -> vector<8x16xf32>
    %13 = tpu.concatenate %2, %12 in 0 : vector<8x16xf32>, vector<8x16xf32> -> vector<16x16xf32>
    %c0_6 = arith.constant 0 : index
    %c0_7 = arith.constant 0 : index
    %14 = vector.load %arg5[%c0_6, %c0_7] : memref<16x16xf32, #tpu.memory_space<vmem>>, vector<16x16xf32>
    %cst_8 = arith.constant dense<0.000000e+00> : vector<16x16xf32>
    %15 = tpu.matmul %13, %14, %cst_8 {dimension_numbers = #tpu.dot_dimension_numbers<[1], [0], [0], [1], [0, 0, 1, 1], [], []>, precision = #tpu.contract_precision<fp32>} : vector<16x16xf32>, vector<16x16xf32>, vector<16x16xf32> -> vector<16x16xf32>
    %cst_9 = arith.constant 0.000000e+00 : f32
    %16 = vector.broadcast %cst_9 : f32 to vector<16x16xf32>
    %17 = arith.maximumf %15, %16 : vector<16x16xf32>
    %c0_10 = arith.constant 0 : index
    %c0_11 = arith.constant 0 : index
    %18 = vector.load %arg6[%c0_10, %c0_11] : memref<16x16xf32, #tpu.memory_space<vmem>>, vector<16x16xf32>
    %cst_12 = arith.constant dense<0.000000e+00> : vector<16x16xf32>
    %19 = tpu.matmul %17, %18, %cst_12 {dimension_numbers = #tpu.dot_dimension_numbers<[1], [0], [0], [1], [0, 0, 1, 1], [], []>, precision = #tpu.contract_precision<fp32>} : vector<16x16xf32>, vector<16x16xf32>, vector<16x16xf32> -> vector<16x16xf32>
    %20 = vector.extract_strided_slice %19 {offsets = [0, 0], sizes = [8, 16], strides = [1, 1]} : vector<16x16xf32> to vector<8x16xf32>
    %21 = vector.extract_strided_slice %19 {offsets = [8, 0], sizes = [8, 16], strides = [1, 1]} : vector<16x16xf32> to vector<8x16xf32>
    %22 = arith.addf %20, %21 : vector<8x16xf32>
    %23 = arith.negf %22 : vector<8x16xf32>
    %24 = math.exp %23 : vector<8x16xf32>
    %cst_13 = arith.constant 1.000000e+00 : f32
    %25 = vector.broadcast %cst_13 : f32 to vector<8x16xf32>
    %26 = arith.addf %25, %24 : vector<8x16xf32>
    %27 = arith.divf %25, %26 : vector<8x16xf32>
    %c0_14 = arith.constant 0 : index
    %c0_15 = arith.constant 0 : index
    %28 = vector.load %arg4[%c0_14, %c0_15] : memref<16x256xf32, #tpu.memory_space<vmem>>, vector<16x256xf32>
    %cst_16 = arith.constant dense<0.000000e+00> : vector<8x256xf32>
    %29 = tpu.matmul %27, %28, %cst_16 {dimension_numbers = #tpu.dot_dimension_numbers<[1], [0], [0], [1], [0, 0, 1, 1], [], []>, precision = #tpu.contract_precision<fp32>} : vector<8x16xf32>, vector<16x256xf32>, vector<8x256xf32> -> vector<8x256xf32>
    %30 = arith.mulf %0, %29 : vector<8x256xf32>
    %c0_17 = arith.constant 0 : index
    %c0_18 = arith.constant 0 : index
    %31 = vector.load %arg7[%c0_17, %c0_18] : memref<8x256xf32, #tpu.memory_space<vmem>>, vector<8x256xf32>
    tpu.vector_store %arg7[%c0_17, %c0_18], %30 {strides = array<i32>} : memref<8x256xf32, #tpu.memory_space<vmem>>, vector<8x256xf32>,
    return
  }
  func.func @transform_0(%arg0: i32) -> (i32, i32) {
    %c0_i32 = arith.constant 0 : i32
    %c0_i32_0 = arith.constant 0 : i32
    return %arg0, %c0_i32 : i32, i32
  }
  func.func @transform_1(%arg0: i32) -> (i32, i32) {
    %c0_i32 = arith.constant 0 : i32
    %c0_i32_0 = arith.constant 0 : i32
    %c0_i32_1 = arith.constant 0 : i32
    return %c0_i32, %c0_i32_0 : i32, i32
  }
  func.func @transform_2(%arg0: i32) -> (i32, i32) {
    %c0_i32 = arith.constant 0 : i32
    %c0_i32_0 = arith.constant 0 : i32
    %c0_i32_1 = arith.constant 0 : i32
    return %c0_i32, %c0_i32_0 : i32, i32
  }
  func.func @transform_3(%arg0: i32) -> (i32, i32) {
    %c0_i32 = arith.constant 0 : i32
    %c0_i32_0 = arith.constant 0 : i32
    %c0_i32_1 = arith.constant 0 : i32
    return %c0_i32, %c0_i32_0 : i32, i32
  }
  func.func @transform_4(%arg0: i32) -> (i32, i32) {
    %c0_i32 = arith.constant 0 : i32
    %c0_i32_0 = arith.constant 0 : i32
    %c0_i32_1 = arith.constant 0 : i32
    return %c0_i32, %c0_i32_0 : i32, i32
  }
  func.func @transform_5(%arg0: i32) -> (i32, i32) {
    %c0_i32 = arith.constant 0 : i32
    %c0_i32_0 = arith.constant 0 : i32
    %c0_i32_1 = arith.constant 0 : i32
    return %c0_i32, %c0_i32_0 : i32, i32
  }
  func.func @transform_6(%arg0: i32) -> (i32, i32) {
    %c0_i32 = arith.constant 0 : i32
    %c0_i32_0 = arith.constant 0 : i32
    return %arg0, %c0_i32 : i32, i32
  }
}

</mosaic_0001>

<bundles_post_ra>
// kernel: tpu_custom_call.1
= control target key start
LH: loop header
LB: loop body
LE: loop exit
PB: predicated region body
PF: predicated region fallthrough
CT: control target
= control target key end

     0   :  { %s3630_s0 = inlined_call_operand.vmem [shape: f32[8,256], index: 0, kind: input, shape index: {}]   ;;  %s3631_s1 = inlined_call_operand.vmem [shape: f32[256,16], index: 1, kind: input, shape index: {}]   ;;  %s3632_s2 = inlined_call_operand.vmem [shape: f32[256,16], index: 2, kind: input, shape index: {}]   ;;  %s3633_s3 = inlined_call_operand.vmem [shape: f32[16,256], index: 3, kind: input, shape index: {}]   ;;  %s3634_s4 = inlined_call_operand.vmem [shape: f32[16,16], index: 4, kind: input, shape index: {}]   ;;  %s3635_s5 = inlined_call_operand.vmem [shape: f32[16,16], index: 5, kind: input, shape index: {}]   ;;  %s3636_s6 = inlined_call_operand.hbm [shape: f32[8,256], index: 6, kind: output, shape index: {}]  }
   0x1   :  { %v2337_v0 = vld [vmem:[%s3630_s0] sm:$0xff] }
   0x2   :  { %11 = vsyncpa [#allocation3], 0  ;;  %s2294_s23 = smov 1   ;;  %v2343_v1 = vld [vmem:[%s3630_s0 + $0x8] sm:$0xff]  ;;  %v744_v2 = vlaneseq  ;;  %s2295_s26 = smov 2   ;;  %v41_v10 = vld [vmem:[%s3631_s1 + $0x78] sm:$0xff] }
   0x3   :  { %740 = vrot.lane.b32.xlu0 %v2337_v0, %s2294_s23  ;;  %v40_v11 = vld [vmem:[%s3631_s1 + $0x70] sm:$0xff]  ;;  %v39_v12 = vld [vmem:[%s3631_s1 + $0x68] sm:$0xff]  ;;  %v2366_v13 = vand.u32 4294901760, %v41_v10  ;;  %v38_v16 = vld [vmem:[%s3631_s1 + $0x60] sm:$0xff]  ;;  %s2296_s19 = smov 4   ;;  %s2297_s29 = smov 8  }
   0x4   :  { %v2346_v4 = vand.u32 127, %v744_v2  ;;  %v2368_v14 = vand.u32 4294901760, %v40_v11  ;;  %v2370_v15 = vand.u32 4294901760, %v39_v12  ;;  %v37_v17 = vld [vmem:[%s3631_s1 + $0x58] sm:$0xff]  ;;  %v36_v18 = vld [vmem:[%s3631_s1 + $0x50] sm:$0xff]  ;;  %v2381_v19 = vand.u32 4294901760, %v38_v16 }
   0x5   :  { %v2383_v20 = vand.u32 4294901760, %v37_v17  ;;  %v2385_v21 = vand.u32 4294901760, %v36_v18  ;;  %v35_v22 = vld [vmem:[%s3631_s1 + $0x48] sm:$0xff]  ;;  %v34_v23 = vld [vmem:[%s3631_s1 + $0x40] sm:$0xff]  ;;  %v2394_v24 = vsub.f32 %v41_v10, %v2366_v13  ;;  %59 = vmatpush.msra.mxu0 %v2366_v13  ;;  %255 = vmatpush.msra.mxu3 %v2366_v13  ;;  %v33_v35 = vld [vmem:[%s3631_s1 + $0x38] sm:$0xff]  ;;  %vm1494_vm4 = vcmask 130048  }
   0x6   :  { %vm746_vm0 = vcmp.lt.s32.totalorder %v2346_v4, 1  ;;  %v2398_v25 = vsub.f32 %v40_v11, %v2368_v14  ;;  %v2402_v26 = vsub.f32 %v39_v12, %v2370_v15  ;;  %v2404_v27 = vand.u32 4294901760, %v35_v22  ;;  %v32_v44 = vld [vmem:[%s3631_s1 + $0x30] sm:$0xff]  ;;  %v31_v45 = vld [vmem:[%s3631_s1 + $0x28] sm:$0xff]  ;;  %v30_v52 = vld [vmem:[%s3631_s1 + $0x20] sm:$0xff]  ;;  %s2247_s27 = sshll.u32 %s3636_s6, 4  ;;  %s2248_s27 = int_to_ptr.hbm [resolvable:$true] %s2247_s27 }
   0x7   :  { %v2407_v28 = vsub.f32 %v38_v16, %v2381_v19  ;;  %v2410_v29 = vsub.f32 %v37_v17, %v2383_v20  ;;  %v2412_v30 = vand.u32 4294901760, %v34_v23  ;;  %202 = vmatpush.msra.mxu2 %v2394_v24  ;;  %61 = vmatpush.msra.mxu0 %v2368_v14  ;;  %v101_v31 = vand.u32 4294901760, %v2394_v24  ;;  %v29_v57 = vld [vmem:[%s3631_s1 + $0x18] sm:$0xff]  ;;  %v28_v2 = vld [vmem:[%s3631_s1 + $0x10] sm:$0xff]  ;;  %v27_v11 = vld [vmem:[%s3631_s1 + $0x8] sm:$0xff] }
   0x8   :  { %v107_v32 = vand.u32 4294901760, %v2398_v25  ;;  %v3647_v33 = vand.u32 4294901760, %v2402_v26  ;;  %v2420_v34 = vsub.f32 %v36_v18, %v2385_v21  ;;  %257 = vmatpush.msra.mxu3 %v2368_v14  ;;  %v2429_v38 = vsub.f32 %v35_v22, %v2404_v27  ;;  %v57_v17 = vld [vmem:[%s3631_s1 + $0xf8] sm:$0xff] }
   0x9   :  { %v3645_v36 = vand.u32 4294901760, %v2407_v28  ;;  %v3644_v37 = vand.u32 4294901760, %v2410_v29  ;;  %205 = vmatpush.msra.mxu2 %v2398_v25  ;;  %v102_v39 = vsub.f32 %v2394_v24, %v101_v31  ;;  %63 = vmatpush.msra.mxu0 %v2370_v15  ;;  %v2444_v42 = vsub.f32 %v34_v23, %v2412_v30 }
   0xa   :  { %v108_v40 = vsub.f32 %v2398_v25, %v107_v32  ;;  %v114_v41 = vsub.f32 %v2402_v26, %v3647_v33  ;;  %259 = vmatpush.msra.mxu3 %v2370_v15  ;;  %v2446_v43 = vand.u32 4294901760, %v33_v35  ;;  %v3642_v49 = vand.u32 4294901760, %v2420_v34 }
   0xb   :  { %742 = vrot.lane.b32.xlu0 %v2343_v1, %s2294_s23  ;;  %v103_v46 = vand.u32 4294901760, %v102_v39  ;;  %208 = vmatpush.msra.mxu2 %v2402_v26  ;;  %v120_v48 = vsub.f32 %v2407_v28, %v3645_v36  ;;  %v126_v50 = vsub.f32 %v2410_v29, %v3644_v37  ;;  %v3641_v51 = vand.u32 4294901760, %v2429_v38  ;;  %s2298_s23 = smov [#allocation2]  }
   0xc   :  { %v109_v47 = vand.u32 4294901760, %v108_v40  ;;  %65 = vmatpush.msra.mxu0 %v2381_v19  ;;  %261 = vmatpush.msra.mxu3 %v2381_v19  ;;  %v115_v53 = vand.u32 4294901760, %v114_v41  ;;  %v2470_v54 = vsub.f32 %v33_v35, %v2446_v43  ;;  %v2472_v55 = vand.u32 4294901760, %v32_v44  ;;  %v26_v35 = vld [vmem:[%s3631_s1] sm:$0xff]  ;;  %s2245_s24 = sshll.u32 %s2298_s23, 4  ;;  %s2246_s24 = int_to_ptr.vmem [resolvable:$true] %s2245_s24 }
   0xd   :  { %104 = vmatpush.msra.mxu1 %v103_v46  ;;  %211 = vmatpush.msra.mxu2 %v2407_v28  ;;  %v2474_v56 = vand.u32 4294901760, %v31_v45  ;;  %v3639_v59 = vand.u32 4294901760, %v2444_v42  ;;  %v121_v60 = vand.u32 4294901760, %v120_v48  ;;  %v132_v61 = vsub.f32 %v2420_v34, %v3642_v49 }
   0xe   :  { %67 = vmatpush.msra.mxu0 %v2383_v20  ;;  %263 = vmatpush.msra.mxu3 %v2383_v20  ;;  %v2489_v62 = vsub.f32 %v32_v44, %v2472_v55  ;;  %v2491_v63 = vand.u32 4294901760, %v30_v52  ;;  %v3637_v10 = vand.u32 4294901760, %v2470_v54  ;;  %v2516_v16 = vand.u32 4294901760, %v28_v2  ;;  %v56_v44 = vld [vmem:[%s3631_s1 + $0xf0] sm:$0xff] }
   0xf   :  { %110 = vmatpush.msra.mxu1 %v109_v47  ;;  %214 = vmatpush.msra.mxu2 %v2410_v29  ;;  %v144_v12 = vsub.f32 %v2444_v42, %v3639_v59  ;;  %v133_v18 = vand.u32 4294901760, %v132_v61  ;;  %vm755_vm1 = vcmp.lt.s32.totalorder %v2346_v4, 2  ;;  %v2536_v41 = vand.u32 4294901760, %v27_v11 }
  0x10   :  { %69 = vmatpush.msra.mxu0 %v2385_v21  ;;  %265 = vmatpush.msra.mxu3 %v2385_v21  ;;  %v3638_v22 = vand.u32 4294901760, %v2489_v62  ;;  %v2524_v23 = vsub.f32 %v30_v52, %v2491_v63  ;;  %v150_v46 = vsub.f32 %v2470_v54, %v3637_v10  ;;  %v2545_v47 = vand.u32 4294901760, %v57_v17 }
  0x11   :  { %116 = vmatpush.msra.mxu1 %v115_v53  ;;  %217 = vmatpush.msra.mxu2 %v2420_v34  ;;  %v2550_v52 = vsub.f32 %v28_v2, %v2516_v16  ;;  %v2552_v53 = vand.u32 4294901760, %v26_v35  ;;  %v2577_v10 = vsub.f32 %v27_v11, %v2536_v41  ;;  %v3677_v24 = vand.u32 4294901760, %v2402_v26 }
  0x12   :  { %71 = vmatpush.msra.mxu0 %v2404_v27  ;;  %267 = vmatpush.msra.mxu3 %v2404_v27  ;;  %v156_v61 = vsub.f32 %v2489_v62, %v3638_v22  ;;  %v3643_v2 = vand.u32 4294901760, %v2524_v23  ;;  %v54_v22 = vld [vmem:[%s3631_s1 + $0xe0] sm:$0xff]  ;;  %v3678_v25 = vand.u32 4294901760, %v2407_v28  ;;  %v3679_v26 = vand.u32 4294901760, %v2410_v29 }
  0x13   :  { %122 = vmatpush.msra.mxu1 %v121_v60  ;;  %220 = vmatpush.msra.mxu2 %v2429_v38  ;;  %v179_v11 = vand.u32 4294901760, %v2550_v52  ;;  %v2605_v49 = vand.u32 4294901760, %v54_v22  ;;  %v3681_v28 = vand.u32 4294901760, %v2429_v38  ;;  %v3683_v29 = vand.u32 4294901760, %v2470_v54 }
  0x14   :  { %73 = vmatpush.msra.mxu0 %v2412_v30  ;;  %269 = vmatpush.msra.mxu3 %v2412_v30  ;;  %vm764_vm2 = vcmp.lt.s32.totalorder %v2346_v4, 4  ;;  %vm773_vm3 = vcmp.lt.s32.totalorder %v2346_v4, 8 }
  0x15   :  { %223 = vmatpush.msra.mxu2 %v2444_v42 }
  0x16   :  { %75 = vmatpush.msra.mxu0 %v2446_v43  ;;  %271 = vmatpush.msra.mxu3 %v2446_v43 }
  0x17   :  { %226 = vmatpush.msra.mxu2 %v2470_v54 }
  0x18   :  { %77 = vmatpush.msra.mxu0 %v2472_v55  ;;  %273 = vmatpush.msra.mxu3 %v2472_v55 }
  0x19   :  { %229 = vmatpush.msra.mxu2 %v2489_v62 }
  0x1a   :  { %79 = vmatpush.msra.mxu0 %v2474_v56  ;;  %275 = vmatpush.msra.mxu3 %v2474_v56 }
  0x1c   :  { %81 = vmatpush.msra.mxu0 %v2491_v63  ;;  %277 = vmatpush.msra.mxu3 %v2491_v63 }
  0x75   :  { %v741_v3 = vpop.permute.xlu0 %740 }
  0x7d   :  { %v743_v5 = vpop.permute.xlu0 %742 }
  0x7e   :  { %v748_v6 = vsel %vm746_vm0, %v743_v5, %v741_v3  ;;  %v747_v8 = vsel %vm746_vm0, %v741_v3, %v743_v5  ;;  %v2499_v3 = vsub.f32 %v31_v45, %v2474_v56  ;;  %v2501_v5 = vand.u32 4294901760, %v29_v57 }
  0x7f   :  { %v2350_v7 = vmax.f32 %v2337_v0, %v748_v6  ;;  %v2354_v9 = vmax.f32 %v2343_v1, %v747_v8  ;;  %v127_v6 = vand.u32 4294901760, %v126_v50  ;;  %v138_v8 = vsub.f32 %v2429_v38, %v3641_v51 }
  0x80   :  { %v3640_v39 = vand.u32 4294901760, %v2499_v3  ;;  %v2534_v40 = vsub.f32 %v29_v57, %v2501_v5  ;;  %v145_v50 = vand.u32 4294901760, %v144_v12  ;;  %v55_v57 = vld [vmem:[%s3631_s1 + $0xe8] sm:$0xff]  ;;  %232 = vmatpush.msra.mxu2 %v2499_v3  ;;  %83 = vmatpush.msra.mxu0 %v2501_v5 }
  0x81   :  { %751 = vrot.lane.b32.xlu1 %v2350_v7, %s2295_s26  ;;  %128 = vmatpush.msra.mxu1 %v127_v6  ;;  %v139_v45 = vand.u32 4294901760, %v138_v8  ;;  %v2565_v6 = vand.u32 4294901760, %v56_v44  ;;  %v2586_v59 = vand.u32 4294901760, %v55_v57 }
  0x82   :  { %v162_v12 = vsub.f32 %v2499_v3, %v3640_v39  ;;  %v2593_v39 = vsub.f32 %v26_v35, %v2552_v53  ;;  %235 = vmatpush.msra.mxu2 %v2524_v23  ;;  %279 = vmatpush.msra.mxu3 %v2501_v5 }
  0x83   :  { %134 = vmatpush.msra.mxu1 %v133_v18  ;;  %v3646_v18 = vand.u32 4294901760, %v2534_v40  ;;  %v2603_v51 = vsub.f32 %v56_v44, %v2565_v6  ;;  %v2619_v37 = vsub.f32 %v55_v57, %v2586_v59  ;;  %v2632_v57 = vsub.f32 %v54_v22, %v2605_v49  ;;  %85 = vmatpush.msra.mxu0 %v2516_v16 }
  0x84   :  { %v163_v35 = vand.u32 4294901760, %v162_v12  ;;  %v180_v12 = vsub.f32 %v2550_v52, %v179_v11  ;;  %238 = vmatpush.msra.mxu2 %v2534_v40  ;;  %281 = vmatpush.msra.mxu3 %v2516_v16 }
  0x85   :  { %140 = vmatpush.msra.mxu1 %v139_v45  ;;  %v53_v45 = vld [vmem:[%s3631_s1 + $0xd8] sm:$0xff]  ;;  %87 = vmatpush.msra.mxu0 %v2536_v41 }
  0x86   :  { %v2621_v36 = vand.u32 4294901760, %v53_v45  ;;  %241 = vmatpush.msra.mxu2 %v2550_v52  ;;  %283 = vmatpush.msra.mxu3 %v2536_v41 }
  0x87   :  { %146 = vmatpush.msra.mxu1 %v145_v50  ;;  %v174_v50 = vsub.f32 %v2534_v40, %v3646_v18  ;;  %89 = vmatpush.msra.mxu0 %v2552_v53 }
  0x88   :  { %244 = vmatpush.msra.mxu2 %v2577_v10  ;;  %285 = vmatpush.msra.mxu3 %v2552_v53 }
  0x89   :  { %753 = vrot.lane.b32.xlu1 %v2354_v9, %s2295_s26  ;;  %v175_v33 = vand.u32 4294901760, %v174_v50  ;;  %296 = vmatpush.msrb.mxu0 %v101_v31  ;;  %v52_v31 = vld [vmem:[%s3631_s1 + $0xd0] sm:$0xff] }
  0x8a   :  { %247 = vmatpush.msra.mxu2 %v2593_v39 }
  0x8b   :  { %300 = vmatpush.msrb.mxu0 %v107_v32  ;;  %v3689_v32 = vand.u32 4294901760, %v2593_v39 }
  0x8c   :  { %400 = vmatpush.msrb.mxu2 %v2545_v47 }
  0x8d   :  { %304 = vmatpush.msrb.mxu0 %v3677_v24  ;;  %v45_v24 = vld [vmem:[%s3631_s1 + $0x98] sm:$0xff] }
  0x8e   :  { %402 = vmatpush.msrb.mxu2 %v2565_v6 }
  0x8f   :  { %308 = vmatpush.msrb.mxu0 %v3678_v25  ;;  %v2813_v25 = vand.u32 4294901760, %v45_v24 }
  0x90   :  { %404 = vmatpush.msrb.mxu2 %v2586_v59 }
  0x91   :  { %312 = vmatpush.msrb.mxu0 %v3679_v26 }
  0x92   :  { %406 = vmatpush.msrb.mxu2 %v2605_v49 }
  0x94   :  { %408 = vmatpush.msrb.mxu2 %v2621_v36 }
  0xf3   :  { %v2479_v58 = vpop.permute.xlu1 %751 }
  0xfb   :  { %v754_v48 = vpop.permute.xlu1 %753 }
  0xfc   :  { %v757_v60 = vsel %vm755_vm1, %v754_v48, %v2479_v58 }
  0xfd   :  { %v2568_v8 = vmax.f32 %v2350_v7, %v757_v60  ;;  %v151_v7 = vand.u32 4294901760, %v150_v46  ;;  %v2584_v60 = vsub.f32 %v57_v17, %v2545_v47  ;;  %v157_v17 = vand.u32 4294901760, %v156_v61 }
  0xfe   :  { %v168_v46 = vsub.f32 %v2524_v23, %v3643_v2  ;;  %v3651_v61 = vand.u32 4294901760, %v2577_v10  ;;  %v756_v2 = vsel %vm755_vm1, %v2479_v58, %v754_v48  ;;  %v3649_v48 = vand.u32 4294901760, %v2593_v39 }
  0xff   :  { %760 = vrot.lane.b32.xlu2 %v2568_v8, %s2296_s19  ;;  %152 = vmatpush.msra.mxu1 %v151_v7  ;;  %v3648_v44 = vand.u32 4294901760, %v2584_v60  ;;  %v3650_v7 = vand.u32 4294901760, %v2603_v51  ;;  %v2635_v18 = vmax.f32 %v2354_v9, %v756_v2  ;;  %v2648_v9 = vsub.f32 %v53_v45, %v2621_v36 }
 0x100   :  { %v169_v58 = vand.u32 4294901760, %v168_v46  ;;  %v454_v46 = vand.u32 4294901760, %v2619_v37  ;;  %v181_v2 = vand.u32 4294901760, %v180_v12  ;;  %v460_v45 = vand.u32 4294901760, %v2632_v57 }
 0x101   :  { %158 = vmatpush.msra.mxu1 %v157_v17  ;;  %v186_v17 = vsub.f32 %v2577_v10, %v3651_v61  ;;  %v443_v22 = vsub.f32 %v2584_v60, %v3648_v44  ;;  %v449_v50 = vsub.f32 %v2603_v51, %v3650_v7 }
 0x102   :  { %v455_v12 = vsub.f32 %v2619_v37, %v454_v46 }
 0x103   :  { %164 = vmatpush.msra.mxu1 %v163_v35  ;;  %v192_v35 = vsub.f32 %v2593_v39, %v3649_v48  ;;  %v444_v44 = vand.u32 4294901760, %v443_v22  ;;  %v466_v48 = vand.u32 4294901760, %v2648_v9  ;;  %v450_v61 = vand.u32 4294901760, %v449_v50 }
 0x105   :  { %170 = vmatpush.msra.mxu1 %v169_v58  ;;  %v187_v58 = vand.u32 4294901760, %v186_v17  ;;  %v193_v7 = vand.u32 4294901760, %v192_v35  ;;  %445 = vmatpush.msrb.mxu3 %v444_v44  ;;  %v456_v17 = vand.u32 4294901760, %v455_v12  ;;  %v467_v22 = vsub.f32 %v2648_v9, %v466_v48 }
 0x107   :  { %762 = vrot.lane.b32.xlu2 %v2635_v18, %s2296_s19  ;;  %176 = vmatpush.msra.mxu1 %v175_v33  ;;  %v461_v33 = vsub.f32 %v2632_v57, %v460_v45  ;;  %v468_v44 = vand.u32 4294901760, %v467_v22 }
 0x108   :  { %451 = vmatpush.msrb.mxu3 %v450_v61 }
 0x109   :  { %182 = vmatpush.msra.mxu1 %v181_v2  ;;  %v462_v2 = vand.u32 4294901760, %v461_v33 }
 0x10a   :  { %457 = vmatpush.msrb.mxu3 %v456_v17 }
 0x10b   :  { %188 = vmatpush.msra.mxu1 %v187_v58  ;;  %v46_v58 = vld [vmem:[%s3631_s1 + $0xa0] sm:$0xff] }
 0x10c   :  { %463 = vmatpush.msrb.mxu3 %v462_v2  ;;  %v2797_v17 = vand.u32 4294901760, %v46_v58 }
 0x10d   :  { %194 = vmatpush.msra.mxu1 %v193_v7 }
 0x10e   :  { %469 = vmatpush.msrb.mxu3 %v468_v44  ;;  %v2816_v26 = vsub.f32 %v46_v58, %v2797_v17 }
 0x10f   :  { %363 = vmatpush.msrb.mxu1 %v2366_v13  ;;  %v2694_v13 = vand.u32 4294901760, %v52_v31 }
 0x111   :  { %365 = vmatpush.msrb.mxu1 %v2368_v14  ;;  %410 = vmatpush.msrb.mxu2 %v2694_v13  ;;  %v3680_v14 = vand.u32 4294901760, %v2420_v34  ;;  %v51_v34 = vld [vmem:[%s3631_s1 + $0xc8] sm:$0xff] }
 0x112   :  { %v2738_v38 = vand.u32 4294901760, %v51_v34 }
 0x113   :  { %367 = vmatpush.msrb.mxu1 %v2370_v15  ;;  %316 = vmatpush.msrb.mxu0 %v3680_v14  ;;  %v3682_v15 = vand.u32 4294901760, %v2444_v42  ;;  %v2741_v42 = vsub.f32 %v52_v31, %v2694_v13 }
 0x114   :  { %412 = vmatpush.msrb.mxu2 %v2738_v38 }
 0x115   :  { %369 = vmatpush.msrb.mxu1 %v2381_v19  ;;  %320 = vmatpush.msrb.mxu0 %v3681_v28  ;;  %v3684_v19 = vand.u32 4294901760, %v2489_v62  ;;  %v472_v54 = vand.u32 4294901760, %v2741_v42  ;;  %v49_v62 = vld [vmem:[%s3631_s1 + $0xb8] sm:$0xff]  ;;  %v44_v28 = vld [vmem:[%s3631_s1 + $0x90] sm:$0xff] }
 0x117   :  { %371 = vmatpush.msrb.mxu1 %v2383_v20  ;;  %324 = vmatpush.msrb.mxu0 %v3682_v15  ;;  %v3685_v20 = vand.u32 4294901760, %v2499_v3 }
 0x119   :  { %373 = vmatpush.msrb.mxu1 %v2385_v21  ;;  %328 = vmatpush.msrb.mxu0 %v3683_v29  ;;  %v3686_v21 = vand.u32 4294901760, %v2524_v23 }
 0x11b   :  { %375 = vmatpush.msrb.mxu1 %v2404_v27  ;;  %332 = vmatpush.msrb.mxu0 %v3684_v19  ;;  %v3687_v27 = vand.u32 4294901760, %v2534_v40  ;;  %v508_v19 = vand.u32 4294901760, %v2816_v26 }
 0x11d   :  { %377 = vmatpush.msrb.mxu1 %v2412_v30  ;;  %336 = vmatpush.msrb.mxu0 %v3685_v20  ;;  %v3688_v30 = vand.u32 4294901760, %v2577_v10  ;;  %v2826_v20 = vand.u32 4294901760, %v44_v28 }
 0x11f   :  { %379 = vmatpush.msrb.mxu1 %v2446_v43  ;;  %340 = vmatpush.msrb.mxu0 %v3686_v21  ;;  %v50_v43 = vld [vmem:[%s3631_s1 + $0xc0] sm:$0xff]  ;;  %v2829_v21 = vsub.f32 %v45_v24, %v2813_v25 }
 0x121   :  { %381 = vmatpush.msrb.mxu1 %v2472_v55  ;;  %344 = vmatpush.msrb.mxu0 %v3687_v27  ;;  %v2748_v55 = vand.u32 4294901760, %v50_v43  ;;  %v43_v27 = vld [vmem:[%s3631_s1 + $0x88] sm:$0xff] }
 0x123   :  { %383 = vmatpush.msrb.mxu1 %v2474_v56  ;;  %348 = vmatpush.msrb.mxu0 %v179_v11  ;;  %v2751_v56 = vsub.f32 %v51_v34, %v2738_v38  ;;  %v2764_v10 = vsub.f32 %v50_v43, %v2748_v55  ;;  %v2838_v34 = vand.u32 4294901760, %v43_v27  ;;  %v2841_v43 = vsub.f32 %v44_v28, %v2826_v20 }
 0x124   :  { %414 = vmatpush.msrb.mxu2 %v2748_v55 }
 0x125   :  { %385 = vmatpush.msrb.mxu1 %v2491_v63  ;;  %352 = vmatpush.msrb.mxu0 %v3688_v30  ;;  %v473_v63 = vsub.f32 %v2741_v42, %v472_v54  ;;  %v478_v3 = vand.u32 4294901760, %v2751_v56  ;;  %v484_v40 = vand.u32 4294901760, %v2764_v10 }
 0x127   :  { %387 = vmatpush.msrb.mxu1 %v2501_v5  ;;  %356 = vmatpush.msrb.mxu0 %v3689_v32  ;;  %v2761_v5 = vand.u32 4294901760, %v49_v62  ;;  %v474_v23 = vand.u32 4294901760, %v473_v63  ;;  %v479_v39 = vsub.f32 %v2751_v56, %v478_v3  ;;  %v485_v61 = vsub.f32 %v2764_v10, %v484_v40  ;;  %v42_v63 = vld [vmem:[%s3631_s1 + $0x80] sm:$0xff] }
 0x128   :  { %v509_v32 = vsub.f32 %v2816_v26, %v508_v19 }
 0x129   :  { %389 = vmatpush.msrb.mxu1 %v2516_v16  ;;  %v48_v16 = vld [vmem:[%s3631_s1 + $0xb0] sm:$0xff]  ;;  %416 = vmatpush.msrb.mxu2 %v2761_v5  ;;  %v2777_v52 = vsub.f32 %v49_v62, %v2761_v5  ;;  %v480_v11 = vand.u32 4294901760, %v479_v39  ;;  %v486_v12 = vand.u32 4294901760, %v485_v61  ;;  %v514_v62 = vand.u32 4294901760, %v2829_v21 }
 0x12a   :  { %475 = vmatpush.msrb.mxu3 %v474_v23  ;;  %v520_v23 = vand.u32 4294901760, %v2841_v43  ;;  %v2849_v39 = vand.u32 4294901760, %v42_v63  ;;  %v2858_v61 = vand.u32 4294901760, %v2337_v0 }
 0x12b   :  { %391 = vmatpush.msrb.mxu1 %v2536_v41  ;;  %v2774_v41 = vand.u32 4294901760, %v48_v16  ;;  %v490_v50 = vand.u32 4294901760, %v2777_v52 }
 0x12c   :  { %481 = vmatpush.msrb.mxu3 %v480_v11  ;;  %v515_v11 = vsub.f32 %v2829_v21, %v514_v62  ;;  %v521_v58 = vsub.f32 %v2841_v43, %v520_v23  ;;  %196 = vmatmul.f32.vlgmr.msra.gmra.mxu1 %v2858_v61 }
 0x12d   :  { %393 = vmatpush.msrb.mxu1 %v2552_v53  ;;  %v47_v53 = vld [vmem:[%s3631_s1 + $0xa8] sm:$0xff]  ;;  %418 = vmatpush.msrb.mxu2 %v2774_v41  ;;  %v2789_v35 = vsub.f32 %v48_v16, %v2774_v41  ;;  %v491_v2 = vsub.f32 %v2777_v52, %v490_v50  ;;  %v510_v16 = vand.u32 4294901760, %v509_v32 }
 0x12e   :  { %v2786_v7 = vand.u32 4294901760, %v47_v53  ;;  %487 = vmatpush.msrb.mxu3 %v486_v12  ;;  %v516_v24 = vand.u32 4294901760, %v515_v11 }
 0x12f   :  { %v496_v33 = vand.u32 4294901760, %v2789_v35  ;;  %v492_v14 = vand.u32 4294901760, %v491_v2  ;;  %v2866_v2 = vsub.f32 %v42_v63, %v2849_v39  ;;  %596 = vmatpush.msra.mxu1 %v2545_v47 }
 0x130   :  { %420 = vmatpush.msrb.mxu2 %v2786_v7  ;;  %v2800_v22 = vsub.f32 %v47_v53, %v2786_v7  ;;  %v2852_v53 = vsub.f32 %v43_v27, %v2838_v34 }
 0x131   :  { %v497_v31 = vsub.f32 %v2789_v35, %v496_v33  ;;  %493 = vmatpush.msrb.mxu3 %v492_v14  ;;  %v522_v14 = vand.u32 4294901760, %v521_v58  ;;  %598 = vmatpush.msra.mxu1 %v2565_v6  ;;  %v2888_v58 = vand.u32 4294901760, %v2343_v1 }
 0x132   :  { %422 = vmatpush.msrb.mxu2 %v2797_v17  ;;  %v502_v44 = vand.u32 4294901760, %v2800_v22  ;;  %v526_v12 = vand.u32 4294901760, %v2852_v53 }
 0x133   :  { %v498_v15 = vand.u32 4294901760, %v497_v31  ;;  %v91_v31 = vsub.f32 %v2337_v0, %v2858_v61  ;;  %600 = vmatpush.msra.mxu1 %v2586_v59 }
 0x134   :  { %v503_v29 = vsub.f32 %v2800_v22, %v502_v44  ;;  %424 = vmatpush.msrb.mxu2 %v2813_v25  ;;  %v527_v28 = vsub.f32 %v2852_v53, %v526_v12  ;;  %395 = vmatmul.f32.vlgmr.msrb.gmra.mxu1 %v2858_v61 }
 0x135   :  { %499 = vmatpush.msrb.mxu3 %v498_v15  ;;  %v532_v15 = vand.u32 4294901760, %v2866_v2  ;;  %250 = vmatmul.f32.vlgmr.msra.gmra.mxu2 %v91_v31 }
 0x136   :  { %v504_v30 = vand.u32 4294901760, %v503_v29  ;;  %426 = vmatpush.msrb.mxu2 %v2826_v20  ;;  %v92_v29 = vand.u32 4294901760, %v91_v31  ;;  %v528_v27 = vand.u32 4294901760, %v527_v28  ;;  %602 = vmatpush.msra.mxu1 %v2605_v49 }
 0x137   :  { %v533_v0 = vsub.f32 %v2866_v2, %v532_v15 }
 0x138   :  { %428 = vmatpush.msrb.mxu2 %v2838_v34  ;;  %505 = vmatpush.msrb.mxu3 %v504_v30  ;;  %v3690_v30 = vand.u32 4294901760, %v2584_v60  ;;  %v93_v32 = vsub.f32 %v91_v31, %v92_v29 }
 0x139   :  { %v534_v63 = vand.u32 4294901760, %v533_v0  ;;  %289 = vmatmul.f32.vlgmr.msra.gmra.mxu3 %v92_v29  ;;  %604 = vmatpush.msra.mxu1 %v2621_v36 }
 0x13a   :  { %430 = vmatpush.msrb.mxu2 %v2849_v39  ;;  %511 = vmatpush.msrb.mxu3 %v510_v16  ;;  %v3691_v16 = vand.u32 4294901760, %v2603_v51  ;;  %v94_v11 = vand.u32 4294901760, %v93_v32  ;;  %v781_v32 = vld [vmem:[%s3632_s2 + $0x18] sm:$0xff] }
 0x13b   :  { %606 = vmatpush.msra.mxu1 %v2694_v13 }
 0x13c   :  { %517 = vmatpush.msrb.mxu3 %v516_v24  ;;  %637 = vmatpush.msra.mxu2 %v3690_v30 }
 0x13d   :  { %95 = vmatmul.f32.vlgmr.msra.gmra.mxu0 %v94_v11  ;;  %608 = vmatpush.msra.mxu1 %v2738_v38 }
 0x13e   :  { %523 = vmatpush.msrb.mxu3 %v522_v14  ;;  %641 = vmatpush.msra.mxu2 %v3691_v16 }
 0x13f   :  { %543 = vmatpush.msra.mxu0 %v2584_v60  ;;  %610 = vmatpush.msra.mxu1 %v2748_v55 }
 0x140   :  { %529 = vmatpush.msrb.mxu3 %v528_v27  ;;  %645 = vmatpush.msra.mxu2 %v454_v46  ;;  %v2902_v46 = vsub.f32 %v2343_v1, %v2888_v58 }
 0x141   :  { %546 = vmatpush.msra.mxu0 %v2603_v51  ;;  %612 = vmatpush.msra.mxu1 %v2761_v5  ;;  %v792_v51 = vld [vmem:[%s3632_s2 + $0x70] sm:$0xff] }
 0x142   :  { %535 = vmatpush.msrb.mxu3 %v534_v63  ;;  %649 = vmatpush.msra.mxu2 %v460_v45  ;;  %v433_v1 = vand.u32 4294901760, %v2902_v46  ;;  %v790_v45 = vld [vmem:[%s3632_s2 + $0x60] sm:$0xff] }
 0x143   :  { %549 = vmatpush.msra.mxu0 %v2619_v37  ;;  %614 = vmatpush.msra.mxu1 %v2774_v41 }
 0x144   :  { %704 = vmatpush.msra.mxu3 %v2545_v47  ;;  %653 = vmatpush.msra.mxu2 %v466_v48  ;;  %v2955_v48 = vand.u32 4294901760, %v792_v51 }
 0x145   :  { %552 = vmatpush.msra.mxu0 %v2632_v57  ;;  %616 = vmatpush.msra.mxu1 %v2786_v7 }
 0x146   :  { %706 = vmatpush.msra.mxu3 %v2565_v6  ;;  %657 = vmatpush.msra.mxu2 %v472_v54  ;;  %v791_v6 = vld [vmem:[%s3632_s2 + $0x68] sm:$0xff] }
 0x147   :  { %555 = vmatpush.msra.mxu0 %v2648_v9  ;;  %537 = vmatmul.f32.vlgmr.msrb.gmra.mxu3 %v2888_v58  ;;  %v2972_v54 = vand.u32 4294901760, %v791_v6 }
 0x148   :  { %708 = vmatpush.msra.mxu3 %v2586_v59  ;;  %661 = vmatpush.msra.mxu2 %v478_v3 }
 0x149   :  { %558 = vmatpush.msra.mxu0 %v2741_v42  ;;  %618 = vmatpush.msra.mxu1 %v2797_v17 }
 0x14a   :  { %710 = vmatpush.msra.mxu3 %v2605_v49  ;;  %665 = vmatpush.msra.mxu2 %v484_v40  ;;  %v434_v49 = vsub.f32 %v2902_v46, %v433_v1  ;;  %v787_v40 = vld [vmem:[%s3632_s2 + $0x48] sm:$0xff] }
 0x14b   :  { %561 = vmatpush.msra.mxu0 %v2751_v56  ;;  %v788_v56 = vld [vmem:[%s3632_s2 + $0x50] sm:$0xff]  ;;  %620 = vmatpush.msra.mxu1 %v2813_v25 }
 0x14c   :  { %712 = vmatpush.msra.mxu3 %v2621_v36  ;;  %669 = vmatpush.msra.mxu2 %v490_v50  ;;  %v793_v36 = vld [vmem:[%s3632_s2 + $0x78] sm:$0xff]  ;;  %v435_v59 = vand.u32 4294901760, %v434_v49  ;;  %v3019_v50 = vand.u32 4294901760, %v787_v40 }
 0x14d   :  { %564 = vmatpush.msra.mxu0 %v2764_v10  ;;  %v2945_v47 = vand.u32 4294901760, %v793_v36  ;;  %622 = vmatpush.msra.mxu1 %v2826_v20 }
 0x14e   :  { %714 = vmatpush.msra.mxu3 %v2694_v13  ;;  %673 = vmatpush.msra.mxu2 %v496_v33 }
 0x14f   :  { %567 = vmatpush.msra.mxu0 %v2777_v52  ;;  %436 = vmatmul.f32.vlgmr.msrb.gmra.mxu2 %v435_v59  ;;  %v2970_v42 = vsub.f32 %v793_v36, %v2945_v47 }
 0x150   :  { %716 = vmatpush.msra.mxu3 %v2738_v38  ;;  %677 = vmatpush.msra.mxu2 %v502_v44 }
 0x151   :  { %358 = vmatmul.f32.vlgmr.msrb.gmra.mxu0 %v2858_v61  ;;  %v3668_v3 = vand.u32 4294901760, %v2970_v42  ;;  %624 = vmatpush.msra.mxu1 %v2838_v34 }
 0x152   :  { %718 = vmatpush.msra.mxu3 %v2748_v55  ;;  %681 = vmatpush.msra.mxu2 %v508_v19  ;;  %v2984_v55 = vand.u32 4294901760, %v790_v45 }
 0x153   :  { %570 = vmatpush.msra.mxu0 %v2789_v35  ;;  %v786_v35 = vld [vmem:[%s3632_s2 + $0x40] sm:$0xff]  ;;  %v854_v33 = vsub.f32 %v2970_v42, %v3668_v3  ;;  %626 = vmatpush.msra.mxu1 %v2849_v39 }
 0x154   :  { %720 = vmatpush.msra.mxu3 %v2761_v5  ;;  %685 = vmatpush.msra.mxu2 %v514_v62  ;;  %v2996_v5 = vsub.f32 %v791_v6, %v2972_v54  ;;  %v3010_v52 = vsub.f32 %v790_v45, %v2984_v55  ;;  %v3033_v44 = vand.u32 4294901760, %v786_v35  ;;  %v779_v6 = vld [vmem:[%s3632_s2 + $0x8] sm:$0xff] }
 0x155   :  { %573 = vmatpush.msra.mxu0 %v2800_v22  ;;  %v855_v62 = vand.u32 4294901760, %v854_v33  ;;  %630 = vmatmul.f32.vlgmr.msra.gmra.mxu1 %v433_v1  ;;  %v780_v1 = vld [vmem:[%s3632_s2 + $0x10] sm:$0xff] }
 0x156   :  { %722 = vmatpush.msra.mxu3 %v2774_v41  ;;  %689 = vmatpush.msra.mxu2 %v520_v23  ;;  %v3663_v19 = vand.u32 4294901760, %v3010_v52  ;;  %v3139_v45 = vand.u32 4294901760, %v780_v1 }
 0x157   :  { %576 = vmatpush.msra.mxu0 %v2816_v26  ;;  %856 = vmatpush.msrb.mxu1 %v855_v62 }
 0x158   :  { %724 = vmatpush.msra.mxu3 %v2786_v7  ;;  %v3012_v7 = vand.u32 4294901760, %v788_v56  ;;  %693 = vmatpush.msra.mxu2 %v526_v12  ;;  %v3067_v12 = vsub.f32 %v786_v35, %v3033_v44  ;;  %v872_v24 = vsub.f32 %v3010_v52, %v3663_v19 }
 0x159   :  { %v761_v37 = vpop.permute.xlu2 %760  ;;  %579 = vmatpush.msra.mxu0 %v2829_v21 }
 0x15a   :  { %726 = vmatpush.msra.mxu3 %v2797_v17  ;;  %v3664_v17 = vand.u32 4294901760, %v2996_v5  ;;  %697 = vmatpush.msra.mxu2 %v532_v15  ;;  %v3046_v21 = vsub.f32 %v788_v56, %v3012_v7  ;;  %v3657_v0 = vand.u32 4294901760, %v3067_v12  ;;  %v873_v63 = vand.u32 4294901760, %v872_v24 }
 0x15b   :  { %582 = vmatpush.msra.mxu0 %v2841_v43  ;;  %699 = vmatmul.f32.vlgmr.msra.gmra.mxu2 %v2888_v58  ;;  %v784_v43 = vld [vmem:[%s3632_s2 + $0x30] sm:$0xff]  ;;  %v3172_v24 = vsub.f32 %v780_v1, %v3139_v45 }
 0x15c   :  { %728 = vmatpush.msra.mxu3 %v2813_v25  ;;  %v785_v25 = vld [vmem:[%s3632_s2 + $0x38] sm:$0xff]  ;;  %v866_v23 = vsub.f32 %v2996_v5, %v3664_v17  ;;  %954 = vmatpush.msrb.mxu2 %v2970_v42  ;;  %v3660_v31 = vand.u32 4294901760, %v3046_v21  ;;  %v3078_v14 = vand.u32 4294901760, %v784_v43  ;;  %v896_v59 = vsub.f32 %v3067_v12, %v3657_v0 }
 0x15d   :  { %585 = vmatpush.msra.mxu0 %v2852_v53  ;;  %v3062_v61 = vand.u32 4294901760, %v785_v25 }
 0x15e   :  { %730 = vmatpush.msra.mxu3 %v2826_v20  ;;  %v3051_v20 = vsub.f32 %v787_v40, %v3019_v50  ;;  %v867_v15 = vand.u32 4294901760, %v866_v23  ;;  %v884_v16 = vsub.f32 %v3046_v21, %v3660_v31  ;;  %v3107_v11 = vsub.f32 %v784_v43, %v3078_v14  ;;  %v809_v40 = vld [vmem:[%s3632_s2 + $0xf8] sm:$0xff]  ;;  %v808_v43 = vld [vmem:[%s3632_s2 + $0xf0] sm:$0xff] }
 0x15f   :  { %588 = vmatpush.msra.mxu0 %v2866_v2  ;;  %v3092_v27 = vsub.f32 %v785_v25, %v3062_v61  ;;  %v897_v62 = vand.u32 4294901760, %v896_v59  ;;  %v806_v59 = vld [vmem:[%s3632_s2 + $0xe0] sm:$0xff] }
 0x160   :  { %732 = vmatpush.msra.mxu3 %v2838_v34  ;;  %591 = vmatmul.f32.vlgmr.msra.gmra.mxu0 %v2902_v46  ;;  %v783_v34 = vld [vmem:[%s3632_s2 + $0x28] sm:$0xff]  ;;  %v3659_v28 = vand.u32 4294901760, %v3051_v20 }
 0x161   :  { %v763_v60 = vpop.permute.xlu2 %762  ;;  %v3094_v30 = vand.u32 4294901760, %v783_v34  ;;  %811 = vmatpush.msrb.mxu0 %v2945_v47  ;;  %v3656_v49 = vand.u32 4294901760, %v3092_v27 }
 0x162   :  { %v765_v57 = vsel %vm764_vm2, %v761_v37, %v763_v60  ;;  %v766_v9 = vsel %vm764_vm2, %v763_v60, %v761_v37  ;;  %734 = vmatpush.msra.mxu3 %v2849_v39  ;;  %v782_v39 = vld [vmem:[%s3632_s2 + $0x20] sm:$0xff]  ;;  %v890_v46 = vsub.f32 %v3051_v20, %v3659_v28  ;;  %v885_v60 = vand.u32 4294901760, %v884_v16 }
 0x163   :  { %v2963_v13 = vmax.f32 %v2568_v8, %v766_v9  ;;  %v2966_v38 = vmax.f32 %v2635_v18, %v765_v57  ;;  %v789_v8 = vld [vmem:[%s3632_s2 + $0x58] sm:$0xff]  ;;  %v2982_v18 = vsub.f32 %v792_v51, %v2955_v48  ;;  %736 = vmatmul.f32.vlgmr.msra.gmra.mxu3 %v2888_v58  ;;  %v3109_v58 = vand.u32 4294901760, %v782_v39  ;;  %813 = vmatpush.msrb.mxu0 %v2955_v48 }
 0x164   :  { %v2998_v10 = vand.u32 4294901760, %v789_v8  ;;  %1007 = vmatpush.msrb.mxu3 %v2945_v47  ;;  %v3122_v36 = vsub.f32 %v783_v34, %v3094_v30  ;;  %v3124_v51 = vand.u32 4294901760, %v781_v32  ;;  %v3654_v57 = vand.u32 4294901760, %v3107_v11 }
 0x165   :  { %769 = vrot.lane.b32.xlu0 %v2963_v13, %s2297_s29  ;;  %771 = vrot.lane.b32.xlu1 %v2966_v38, %s2297_s29  ;;  %v3667_v41 = vand.u32 4294901760, %v2982_v18  ;;  %v3137_v9 = vsub.f32 %v782_v39, %v3109_v58  ;;  %v891_v56 = vand.u32 4294901760, %v890_v46  ;;  %v902_v35 = vsub.f32 %v3092_v27, %v3656_v49 }
 0x166   :  { %v3029_v22 = vsub.f32 %v789_v8, %v2998_v10  ;;  %957 = vmatpush.msrb.mxu2 %v2982_v18  ;;  %1009 = vmatpush.msrb.mxu3 %v2955_v48  ;;  %v778_v8 = vld [vmem:[%s3632_s2] sm:$0xff]  ;;  %v3653_v33 = vand.u32 4294901760, %v3122_v36  ;;  %v3155_v25 = vsub.f32 %v781_v32, %v3124_v51  ;;  %v908_v34 = vsub.f32 %v3107_v11, %v3654_v57 }
 0x167   :  { %v860_v26 = vsub.f32 %v2982_v18, %v3667_v41  ;;  %815 = vmatpush.msrb.mxu0 %v2972_v54  ;;  %v3164_v23 = vand.u32 4294901760, %v778_v8  ;;  %v3174_v39 = vand.u32 4294901760, %v809_v40  ;;  %v903_v32 = vand.u32 4294901760, %v902_v35 }
 0x168   :  { %v3661_v53 = vand.u32 4294901760, %v3029_v22  ;;  %960 = vmatpush.msrb.mxu2 %v2996_v5  ;;  %1011 = vmatpush.msrb.mxu3 %v2972_v54  ;;  %v3655_v16 = vand.u32 4294901760, %v3155_v25 }
 0x169   :  { %v861_v2 = vand.u32 4294901760, %v860_v26  ;;  %817 = vmatpush.msrb.mxu0 %v2984_v55  ;;  %v3157_v26 = vand.u32 4294901760, %v779_v6  ;;  %v3194_v1 = vsub.f32 %v778_v8, %v3164_v23  ;;  %v3207_v35 = vsub.f32 %v809_v40, %v3174_v39 }
 0x16a   :  { %v878_v29 = vsub.f32 %v3029_v22, %v3661_v53  ;;  %963 = vmatpush.msrb.mxu2 %v3010_v52  ;;  %1013 = vmatpush.msrb.mxu3 %v2984_v55  ;;  %v926_v40 = vsub.f32 %v3155_v25, %v3655_v16  ;;  %v802_v53 = vld [vmem:[%s3632_s2 + $0xc0] sm:$0xff] }
 0x16b   :  { %862 = vmatpush.msrb.mxu1 %v861_v2  ;;  %819 = vmatpush.msrb.mxu0 %v2998_v10  ;;  %v3652_v2 = vand.u32 4294901760, %v3137_v9  ;;  %v3189_v46 = vsub.f32 %v779_v6, %v3157_v26  ;;  %3692 = vst [vmem:[#allocation5_spill] sm:$0xff] %v3207_v35  ;;  %v3666_v49 = vand.u32 4294901760, %v3207_v35  ;;  %v3286_v41 = vand.u32 4294901760, %v802_v53 }
 0x16c   :  { %v879_v37 = vand.u32 4294901760, %v878_v29  ;;  %966 = vmatpush.msrb.mxu2 %v3029_v22  ;;  %1015 = vmatpush.msrb.mxu3 %v2998_v10  ;;  %v3181_v29 = vand.u32 4294901760, %v808_v43 }
 0x16d   :  { %868 = vmatpush.msrb.mxu1 %v867_v15  ;;  %v807_v15 = vld [vmem:[%s3632_s2 + $0xe8] sm:$0xff]  ;;  %821 = vmatpush.msrb.mxu0 %v3012_v7  ;;  %v920_v6 = vsub.f32 %v3137_v9, %v3652_v2  ;;  %v3662_v2 = vand.u32 4294901760, %v3189_v46 }
 0x16e   :  { %969 = vmatpush.msrb.mxu2 %v3046_v21  ;;  %1017 = vmatpush.msrb.mxu3 %v3012_v7  ;;  %v3212_v8 = vsub.f32 %v808_v43, %v3181_v29  ;;  %v3665_v43 = vand.u32 4294901760, %v3194_v1 }
 0x16f   :  { %874 = vmatpush.msrb.mxu1 %v873_v63  ;;  %v914_v63 = vsub.f32 %v3122_v36, %v3653_v33  ;;  %823 = vmatpush.msrb.mxu0 %v3019_v50  ;;  %v3222_v33 = vand.u32 4294901760, %v806_v59 }
 0x170   :  { %972 = vmatpush.msrb.mxu2 %v3051_v20  ;;  %1019 = vmatpush.msrb.mxu3 %v3019_v50  ;;  %3693 = vst [vmem:[#allocation6_spill] sm:$0xff] %v3212_v8 }
 0x171   :  { %880 = vmatpush.msrb.mxu1 %v879_v37  ;;  %v3196_v37 = vand.u32 4294901760, %v807_v15  ;;  %825 = vmatpush.msrb.mxu0 %v3033_v44  ;;  %v3251_v28 = vsub.f32 %v806_v59, %v3222_v33  ;;  %v1195_v59 = vsub.f32 %v3207_v35, %v3666_v49 }
 0x172   :  { %975 = vmatpush.msrb.mxu2 %v3067_v12  ;;  %1021 = vmatpush.msrb.mxu3 %v3033_v44 }
 0x173   :  { %886 = vmatpush.msrb.mxu1 %v885_v60  ;;  %v909_v60 = vand.u32 4294901760, %v908_v34  ;;  %v915_v34 = vand.u32 4294901760, %v914_v63  ;;  %827 = vmatpush.msrb.mxu0 %v3062_v61  ;;  %v3228_v57 = vsub.f32 %v807_v15, %v3196_v37  ;;  %v921_v63 = vand.u32 4294901760, %v920_v6 }
 0x174   :  { %978 = vmatpush.msrb.mxu2 %v3092_v27  ;;  %1023 = vmatpush.msrb.mxu3 %v3062_v61  ;;  %v3669_v15 = vand.u32 4294901760, %v3212_v8  ;;  %v927_v6 = vand.u32 4294901760, %v926_v40 }
 0x175   :  { %892 = vmatpush.msrb.mxu1 %v891_v56  ;;  %v3658_v56 = vand.u32 4294901760, %v3172_v24  ;;  %3694 = vst [vmem:[#allocation7_spill] sm:$0xff] %v3228_v57  ;;  %829 = vmatpush.msrb.mxu0 %v3078_v14  ;;  %v3670_v40 = vand.u32 4294901760, %v3228_v57 }
 0x176   :  { %981 = vmatpush.msrb.mxu2 %v3107_v11  ;;  %1025 = vmatpush.msrb.mxu3 %v3078_v14 }
 0x177   :  { %898 = vmatpush.msrb.mxu1 %v897_v62  ;;  %v805_v62 = vld [vmem:[%s3632_s2 + $0xd8] sm:$0xff]  ;;  %v932_v16 = vsub.f32 %v3172_v24, %v3658_v56  ;;  %v938_v56 = vsub.f32 %v3189_v46, %v3662_v2  ;;  %831 = vmatpush.msrb.mxu0 %v3094_v30 }
 0x178   :  { %984 = vmatpush.msrb.mxu2 %v3122_v36  ;;  %v3238_v0 = vand.u32 4294901760, %v805_v62  ;;  %1027 = vmatpush.msrb.mxu3 %v3094_v30 }
 0x179   :  { %904 = vmatpush.msrb.mxu1 %v903_v32  ;;  %v804_v32 = vld [vmem:[%s3632_s2 + $0xd0] sm:$0xff]  ;;  %v933_v2 = vand.u32 4294901760, %v932_v16  ;;  %833 = vmatpush.msrb.mxu0 %v3109_v58  ;;  %v801_v16 = vld [vmem:[%s3632_s2 + $0xb8] sm:$0xff] }
 0x17a   :  { %987 = vmatpush.msrb.mxu2 %v3137_v9  ;;  %v3253_v31 = vand.u32 4294901760, %v804_v32  ;;  %1029 = vmatpush.msrb.mxu3 %v3109_v58  ;;  %v3269_v19 = vsub.f32 %v805_v62, %v3238_v0  ;;  %v3301_v62 = vand.u32 4294901760, %v801_v16 }
 0x17b   :  { %910 = vmatpush.msrb.mxu1 %v909_v60  ;;  %v803_v60 = vld [vmem:[%s3632_s2 + $0xc8] sm:$0xff]  ;;  %835 = vmatpush.msrb.mxu0 %v3124_v51 }
 0x17c   :  { %990 = vmatpush.msrb.mxu2 %v3155_v25  ;;  %v3271_v17 = vand.u32 4294901760, %v803_v60  ;;  %1031 = vmatpush.msrb.mxu3 %v3124_v51  ;;  %v3284_v49 = vsub.f32 %v804_v32, %v3253_v31  ;;  %v1196_v32 = vand.u32 4294901760, %v1195_v59 }
 0x17d   :  { %916 = vmatpush.msrb.mxu1 %v915_v34  ;;  %v944_v34 = vsub.f32 %v3194_v1, %v3665_v43  ;;  %v939_v43 = vand.u32 4294901760, %v938_v56  ;;  %v800_v56 = vld [vmem:[%s3632_s2 + $0xb0] sm:$0xff]  ;;  %837 = vmatpush.msrb.mxu0 %v3139_v45 }
 0x17e   :  { %993 = vmatpush.msrb.mxu2 %v3172_v24  ;;  %1033 = vmatpush.msrb.mxu3 %v3139_v45 }
 0x17f   :  { %922 = vmatpush.msrb.mxu1 %v921_v63  ;;  %v1201_v63 = vsub.f32 %v3212_v8, %v3669_v15  ;;  %v945_v3 = vand.u32 4294901760, %v944_v34  ;;  %v1207_v15 = vsub.f32 %v3228_v57, %v3670_v40  ;;  %v3299_v34 = vsub.f32 %v803_v60, %v3271_v17  ;;  %v799_v57 = vld [vmem:[%s3632_s2 + $0xa8] sm:$0xff]  ;;  %839 = vmatpush.msrb.mxu0 %v3157_v26 }
 0x180   :  { %996 = vmatpush.msrb.mxu2 %v3189_v46  ;;  %1035 = vmatpush.msrb.mxu3 %v3157_v26  ;;  %v3316_v8 = vand.u32 4294901760, %v800_v56  ;;  %v3325_v60 = vsub.f32 %v801_v16, %v3301_v62 }
 0x181   :  { %928 = vmatpush.msrb.mxu1 %v927_v6  ;;  %v1202_v40 = vand.u32 4294901760, %v1201_v63  ;;  %v3314_v6 = vsub.f32 %v802_v53, %v3286_v41  ;;  %v1208_v63 = vand.u32 4294901760, %v1207_v15  ;;  %v3327_v53 = vand.u32 4294901760, %v799_v57  ;;  %841 = vmatpush.msrb.mxu0 %v3164_v23 }
 0x182   :  { %999 = vmatpush.msrb.mxu2 %v3194_v1  ;;  %1037 = vmatpush.msrb.mxu3 %v3164_v23  ;;  %v3697_v15 = vand.u32 4294901760, %v3284_v49 }
 0x183   :  { %934 = vmatpush.msrb.mxu1 %v933_v2  ;;  %v3695_v2 = vand.u32 4294901760, %v3251_v28 }
 0x184   :  { %1152 = vmatpush.msra.mxu2 %v3174_v39  ;;  %1197 = vmatpush.msra.mxu3 %v1196_v32  ;;  %v1225_v32 = vsub.f32 %v3284_v49, %v3697_v15  ;;  %v3347_v15 = vsub.f32 %v799_v57, %v3327_v53  ;;  %v3700_v57 = vand.u32 4294901760, %v2982_v18 }
 0x185   :  { %940 = vmatpush.msrb.mxu1 %v939_v43  ;;  %v1213_v59 = vsub.f32 %v3251_v28, %v3695_v2  ;;  %v3696_v43 = vand.u32 4294901760, %v3269_v19  ;;  %v3337_v2 = vsub.f32 %v800_v56, %v3316_v8  ;;  %v3699_v56 = vand.u32 4294901760, %v2970_v42 }
 0x186   :  { %1154 = vmatpush.msra.mxu2 %v3181_v29  ;;  %1203 = vmatpush.msra.mxu3 %v1202_v40  ;;  %v3698_v40 = vand.u32 4294901760, %v3299_v34 }
 0x187   :  { %946 = vmatpush.msrb.mxu1 %v945_v3  ;;  %v1219_v35 = vsub.f32 %v3269_v19, %v3696_v43  ;;  %v1214_v3 = vand.u32 4294901760, %v1213_v59  ;;  %v1236_v43 = vand.u32 4294901760, %v3314_v6  ;;  %v1242_v59 = vand.u32 4294901760, %v3325_v60  ;;  %1048 = vmatpush.msra.mxu0 %v3699_v56 }
 0x188   :  { %1156 = vmatpush.msra.mxu2 %v3196_v37  ;;  %1209 = vmatpush.msra.mxu3 %v1208_v63  ;;  %v1231_v16 = vsub.f32 %v3299_v34, %v3698_v40  ;;  %v1248_v63 = vand.u32 4294901760, %v3337_v2  ;;  %v3703_v40 = vand.u32 4294901760, %v3029_v22  ;;  %v798_v22 = vld [vmem:[%s3632_s2 + $0xa0] sm:$0xff] }
 0x189   :  { %1115 = vmatpush.msra.mxu1 %v2945_v47  ;;  %v1220_v47 = vand.u32 4294901760, %v1219_v35  ;;  %v1237_v35 = vsub.f32 %v3314_v6, %v1236_v43  ;;  %1052 = vmatpush.msra.mxu0 %v3700_v57 }
 0x18a   :  { %1158 = vmatpush.msra.mxu2 %v3222_v33  ;;  %1215 = vmatpush.msra.mxu3 %v1214_v3  ;;  %v1232_v42 = vand.u32 4294901760, %v1231_v16  ;;  %v1254_v3 = vand.u32 4294901760, %v3347_v15 }
 0x18b   :  { %1117 = vmatpush.msra.mxu1 %v2955_v48  ;;  %v1226_v48 = vand.u32 4294901760, %v1225_v32  ;;  %v3701_v32 = vand.u32 4294901760, %v2996_v5  ;;  %v1238_v18 = vand.u32 4294901760, %v1237_v35 }
 0x18c   :  { %1160 = vmatpush.msra.mxu2 %v3238_v0  ;;  %1221 = vmatpush.msra.mxu3 %v1220_v47  ;;  %v3702_v47 = vand.u32 4294901760, %v3010_v52  ;;  %v1255_v5 = vsub.f32 %v3347_v15, %v1254_v3  ;;  %v3704_v52 = vand.u32 4294901760, %v3046_v21  ;;  %v3398_v21 = vand.u32 4294901760, %v798_v22 }
 0x18d   :  { %1119 = vmatpush.msra.mxu1 %v2972_v54  ;;  %v1243_v54 = vsub.f32 %v3325_v60, %v1242_v59  ;;  %1056 = vmatpush.msra.mxu0 %v3701_v32  ;;  %v794_v32 = vld [vmem:[%s3632_s2 + $0x80] sm:$0xff] }
 0x18e   :  { %1162 = vmatpush.msra.mxu2 %v3253_v31  ;;  %1227 = vmatpush.msra.mxu3 %v1226_v48  ;;  %v1256_v16 = vand.u32 4294901760, %v1255_v5 }
 0x18f   :  { %1121 = vmatpush.msra.mxu1 %v2984_v55  ;;  %v1249_v55 = vsub.f32 %v3337_v2, %v1248_v63  ;;  %1060 = vmatpush.msra.mxu0 %v3702_v47 }
 0x190   :  { %1164 = vmatpush.msra.mxu2 %v3271_v17  ;;  %1233 = vmatpush.msra.mxu3 %v1232_v42 }
 0x191   :  { %1123 = vmatpush.msra.mxu1 %v2998_v10  ;;  %v1244_v10 = vand.u32 4294901760, %v1243_v54  ;;  %1064 = vmatpush.msra.mxu0 %v3703_v40 }
 0x192   :  { %1166 = vmatpush.msra.mxu2 %v3286_v41  ;;  %1239 = vmatpush.msra.mxu3 %v1238_v18  ;;  %v3462_v18 = vand.u32 4294901760, %v794_v32 }
 0x193   :  { %1125 = vmatpush.msra.mxu1 %v3012_v7  ;;  %v1250_v7 = vand.u32 4294901760, %v1249_v55  ;;  %1068 = vmatpush.msra.mxu0 %v3704_v52 }
 0x194   :  { %1168 = vmatpush.msra.mxu2 %v3301_v62  ;;  %1245 = vmatpush.msra.mxu3 %v1244_v10  ;;  %v3473_v5 = vsub.f32 %v794_v32, %v3462_v18  ;;  %v3717_v32 = vld [vmem:[#allocation6_spill] sm:$0xff] }
 0x195   :  { %1127 = vmatpush.msra.mxu1 %v3019_v50  ;;  %v3705_v50 = vand.u32 4294901760, %v3051_v20  ;;  %v3707_v20 = vand.u32 4294901760, %v3092_v27  ;;  %v3711_v27 = vand.u32 4294901760, %v3155_v25 }
 0x196   :  { %1170 = vmatpush.msra.mxu2 %v3316_v8  ;;  %1251 = vmatpush.msra.mxu3 %v1250_v7  ;;  %v1284_v52 = vand.u32 4294901760, %v3473_v5 }
 0x197   :  { %1129 = vmatpush.msra.mxu1 %v3033_v44  ;;  %1072 = vmatpush.msra.mxu0 %v3705_v50  ;;  %v3706_v44 = vand.u32 4294901760, %v3067_v12  ;;  %v3709_v12 = vand.u32 4294901760, %v3122_v36  ;;  %v3712_v36 = vand.u32 4294901760, %v3172_v24 }
 0x198   :  { %1172 = vmatpush.msra.mxu2 %v3327_v53  ;;  %1257 = vmatpush.msra.mxu3 %v1256_v16  ;;  %v1285_v50 = vsub.f32 %v3473_v5, %v1284_v52 }
 0x199   :  { %1131 = vmatpush.msra.mxu1 %v3062_v61  ;;  %1076 = vmatpush.msra.mxu0 %v3706_v44  ;;  %v3708_v61 = vand.u32 4294901760, %v3107_v11 }
 0x19a   :  { %1174 = vmatpush.msra.mxu2 %v3398_v21 }
 0x19b   :  { %1133 = vmatpush.msra.mxu1 %v3078_v14  ;;  %1080 = vmatpush.msra.mxu0 %v3707_v20  ;;  %v3710_v14 = vand.u32 4294901760, %v3137_v9 }
 0x19d   :  { %1135 = vmatpush.msra.mxu1 %v3094_v30  ;;  %1084 = vmatpush.msra.mxu0 %v3708_v61  ;;  %v797_v30 = vld [vmem:[%s3632_s2 + $0x98] sm:$0xff] }
 0x19e   :  { %v3419_v11 = vand.u32 4294901760, %v797_v30 }
 0x19f   :  { %1137 = vmatpush.msra.mxu1 %v3109_v58  ;;  %1088 = vmatpush.msra.mxu0 %v3709_v12  ;;  %v3422_v58 = vsub.f32 %v798_v22, %v3398_v21  ;;  %v1286_v22 = vand.u32 4294901760, %v1285_v50  ;;  %v3719_v50 = vld [vmem:[#allocation7_spill] sm:$0xff] }
 0x1a0   :  { %1176 = vmatpush.msra.mxu2 %v3419_v11  ;;  %v3435_v25 = vsub.f32 %v797_v30, %v3419_v11 }
 0x1a1   :  { %1139 = vmatpush.msra.mxu1 %v3124_v51  ;;  %1092 = vmatpush.msra.mxu0 %v3710_v14  ;;  %v796_v51 = vld [vmem:[%s3632_s2 + $0x90] sm:$0xff]  ;;  %v1260_v9 = vand.u32 4294901760, %v3422_v58 }
 0x1a2   :  { %v1266_v56 = vand.u32 4294901760, %v3435_v25 }
 0x1a3   :  { %1141 = vmatpush.msra.mxu1 %v3139_v45  ;;  %1096 = vmatpush.msra.mxu0 %v3711_v27  ;;  %v3432_v45 = vand.u32 4294901760, %v796_v51  ;;  %v1261_v24 = vsub.f32 %v3422_v58, %v1260_v9 }
 0x1a4   :  { %v1267_v42 = vsub.f32 %v3435_v25, %v1266_v56 }
 0x1a5   :  { %1143 = vmatpush.msra.mxu1 %v3157_v26  ;;  %1100 = vmatpush.msra.mxu0 %v3712_v36  ;;  %v3713_v26 = vand.u32 4294901760, %v3189_v46  ;;  %v3450_v35 = vsub.f32 %v796_v51, %v3432_v45  ;;  %v3714_v46 = vand.u32 4294901760, %v3194_v1  ;;  %v1262_v57 = vand.u32 4294901760, %v1261_v24 }
 0x1a6   :  { %1178 = vmatpush.msra.mxu2 %v3432_v45  ;;  %v1268_v1 = vand.u32 4294901760, %v1267_v42 }
 0x1a7   :  { %1145 = vmatpush.msra.mxu1 %v3164_v23  ;;  %1104 = vmatpush.msra.mxu0 %v3713_v26  ;;  %v795_v23 = vld [vmem:[%s3632_s2 + $0x88] sm:$0xff]  ;;  %v1272_v54 = vand.u32 4294901760, %v3450_v35 }
 0x1a8   :  { %v3447_v48 = vand.u32 4294901760, %v795_v23  ;;  %1263 = vmatpush.msra.mxu3 %v1262_v57 }
 0x1a9   :  { %1108 = vmatpush.msra.mxu0 %v3714_v46  ;;  %v1273_v47 = vsub.f32 %v3450_v35, %v1272_v54 }
 0x1aa   :  { %1180 = vmatpush.msra.mxu2 %v3447_v48  ;;  %v3465_v55 = vsub.f32 %v795_v23, %v3447_v48  ;;  %1269 = vmatpush.msra.mxu3 %v1268_v1  ;;  %v3718_v1 = vand.u32 4294901760, %v3717_v32 }
 0x1ab   :  { %v1274_v40 = vand.u32 4294901760, %v1273_v47 }
 0x1ac   :  { %1182 = vmatpush.msra.mxu2 %v3462_v18  ;;  %v1278_v10 = vand.u32 4294901760, %v3465_v55 }
 0x1ad   :  { %1275 = vmatpush.msra.mxu3 %v1274_v40 }
 0x1ae   :  { %v1279_v7 = vsub.f32 %v3465_v55, %v1278_v10 }
 0x1b0   :  { %v1280_v16 = vand.u32 4294901760, %v1279_v7 }
 0x1b2   :  { %1281 = vmatpush.msra.mxu3 %v1280_v16 }
 0x1b4   :  { %1287 = vmatpush.msra.mxu3 %v1286_v22  ;;  %v3720_v22 = vand.u32 4294901760, %v3719_v50 }
 0x1b8   :  { %v251_v40 = vpop.f32.mrf.mxu2 }
 0x1ba   :  { %v96_v23 = vpop.f32.mrf.mxu0 }
 0x1d7   :  { %v770_v44 = vpop.permute.xlu0 %769  ;;  %v772_v20 = vpop.permute.xlu1 %771 }
 0x1d8   :  { %v774_v61 = vsel %vm773_vm3, %v770_v44, %v772_v20  ;;  %v775_v12 = vsel %vm773_vm3, %v772_v20, %v770_v44  ;;  %v290_v44 = vpop.f32.mrf.mxu3 }
 0x1d9   :  { %v776_v14 = vmax.f32 %v2963_v13, %v775_v12  ;;  %v777_v27 = vmax.f32 %v2966_v38, %v774_v61  ;;  %v3715_v13 = vld [vmem:[#allocation5_spill] sm:$0xff]  ;;  %v197_v38 = vpop.f32.mrf.mxu1  ;;  %v359_v61 = vpop.f32.mrf.mxu0 }
 0x1da   :  { %v3716_v46 = vand.u32 4294901760, %v3715_v13  ;;  %v198_v42 = vadd.f32 %v197_v38, %v96_v23  ;;  %v437_v23 = vpop.f32.mrf.mxu2 }
 0x1db   :  { %v842_v30 = vand.u32 4294901760, %v776_v14  ;;  %v3485_v36 = vand.u32 4294901760, %v777_v27 }
 0x1dc   :  { %v252_v16 = vadd.f32 %v251_v40, %v198_v42  ;;  %v1493_v42 = vld [vmem:[%s3634_s4 + $0x8] sm:$0xff] }
 0x1dd   :  { %v843_v51 = vsub.f32 %v776_v14, %v842_v30  ;;  %v3488_v26 = vsub.f32 %v777_v27, %v3485_v36  ;;  %948 = vmatmul.f32.vlgmr.msrb.gmra.mxu1 %v842_v30 }
 0x1de   :  { %1348 = vmatpush.msrb.mxu1 %v3174_v39  ;;  %v291_v20 = vadd.f32 %v290_v44, %v252_v16 }
 0x1df   :  { %v1185_v4 = vand.u32 4294901760, %v3488_v26  ;;  %1002 = vmatmul.f32.vlgmr.msrb.gmra.mxu2 %v843_v51  ;;  %v844_v24 = vand.u32 4294901760, %v843_v51 }
 0x1e0   :  { %1350 = vmatpush.msrb.mxu1 %v3181_v29  ;;  %1389 = vmatpush.msrb.mxu2 %v3716_v46  ;;  %v360_v14 = vadd.f32 %v359_v61, %v291_v20 }
 0x1e1   :  { %1041 = vmatmul.f32.vlgmr.msrb.gmra.mxu3 %v844_v24  ;;  %v845_v57 = vsub.f32 %v843_v51, %v844_v24  ;;  %v1186_v47 = vsub.f32 %v3488_v26, %v1185_v4  ;;  %v396_v27 = vpop.f32.mrf.mxu1  ;;  %v3722_v51 = vand.u32 4294901760, %v3269_v19  ;;  %v592_v38 = vpop.f32.mrf.mxu0 }
 0x1e2   :  { %1352 = vmatpush.msrb.mxu1 %v3196_v37  ;;  %1393 = vmatpush.msrb.mxu2 %v3718_v1 }
 0x1e3   :  { %1456 = vmatpush.msrb.mxu3 %v3174_v39  ;;  %v846_v7 = vand.u32 4294901760, %v845_v57  ;;  %v1187_v12 = vand.u32 4294901760, %v1186_v47  ;;  %v3721_v39 = vand.u32 4294901760, %v3251_v28 }
 0x1e4   :  { %1354 = vmatpush.msrb.mxu1 %v3222_v33  ;;  %1397 = vmatpush.msrb.mxu2 %v3720_v22 }
 0x1e5   :  { %1458 = vmatpush.msrb.mxu3 %v3181_v29  ;;  %847 = vmatmul.f32.vlgmr.msrb.gmra.mxu0 %v846_v7  ;;  %v397_v29 = vadd.f32 %v396_v27, %v360_v14  ;;  %v1694_v27 = vld [vmem:[%s3635_s5 + $0x8] sm:$0xff] }
 0x1e6   :  { %1147 = vmatmul.f32.vlgmr.msra.gmra.mxu1 %v842_v30  ;;  %1295 = vmatpush.msrb.mxu0 %v3715_v13  ;;  %v538_v13 = vpop.f32.mrf.mxu3 }
 0x1e7   :  { %1356 = vmatpush.msrb.mxu1 %v3238_v0  ;;  %1401 = vmatpush.msrb.mxu2 %v3721_v39  ;;  %v438_v24 = vadd.f32 %v437_v23, %v397_v29  ;;  %v1715_v29 = vand.u32 4294901760, %v1694_v27 }
 0x1e8   :  { %1460 = vmatpush.msrb.mxu3 %v3196_v37  ;;  %1188 = vmatmul.f32.vlgmr.msra.gmra.mxu2 %v1187_v12  ;;  %v3723_v37 = vand.u32 4294901760, %v3284_v49 }
 0x1e9   :  { %1298 = vmatpush.msrb.mxu0 %v3717_v32  ;;  %1358 = vmatpush.msrb.mxu1 %v3253_v31  ;;  %v539_v46 = vadd.f32 %v538_v13, %v438_v24  ;;  %v3540_v32 = vand.u32 4294901760, %v1493_v42  ;;  %v1751_v23 = vsub.f32 %v1694_v27, %v1715_v29 }
 0x1ea   :  { %1405 = vmatpush.msrb.mxu2 %v3722_v51  ;;  %1462 = vmatpush.msrb.mxu3 %v3222_v33  ;;  %v3724_v33 = vand.u32 4294901760, %v3299_v34  ;;  %v1693_v51 = vld [vmem:[%s3635_s5] sm:$0xff] }
 0x1eb   :  { %1289 = vmatmul.f32.vlgmr.msra.gmra.mxu3 %v3485_v36  ;;  %1301 = vmatpush.msrb.mxu0 %v3719_v50  ;;  %v593_v57 = vadd.f32 %v592_v38, %v539_v46  ;;  %v1717_v24 = vand.u32 4294901760, %v1693_v51 }
 0x1ec   :  { %1360 = vmatpush.msrb.mxu1 %v3271_v17  ;;  %1409 = vmatpush.msrb.mxu2 %v3723_v37  ;;  %v1752_v37 = vand.u32 4294901760, %v1751_v23 }
 0x1ed   :  { %1464 = vmatpush.msrb.mxu3 %v3238_v0  ;;  %1304 = vmatpush.msrb.mxu0 %v3251_v28  ;;  %v631_v28 = vpop.f32.mrf.mxu1  ;;  %v1757_v13 = vsub.f32 %v1693_v51, %v1717_v24 }
 0x1ee   :  { %1362 = vmatpush.msrb.mxu1 %v3286_v41  ;;  %1413 = vmatpush.msrb.mxu2 %v3724_v33  ;;  %v632_v0 = vadd.f32 %v631_v28, %v593_v57  ;;  %v1753_v46 = vsub.f32 %v1751_v23, %v1752_v37 }
 0x1ef   :  { %1466 = vmatpush.msrb.mxu3 %v3253_v31  ;;  %1110 = vmatmul.f32.vlgmr.msra.gmra.mxu0 %v842_v30  ;;  %v1492_v31 = vld [vmem:[%s3634_s4] sm:$0xff]  ;;  %v700_v30 = vpop.f32.mrf.mxu2  ;;  %v1758_v38 = vand.u32 4294901760, %v1757_v13 }
 0x1f0   :  { %1307 = vmatpush.msrb.mxu0 %v3269_v19  ;;  %1364 = vmatpush.msrb.mxu1 %v3301_v62  ;;  %v701_v19 = vadd.f32 %v700_v30, %v632_v0  ;;  %v1754_v33 = vand.u32 4294901760, %v1753_v46 }
 0x1f1   :  { %1417 = vmatpush.msrb.mxu2 %v1236_v43  ;;  %1468 = vmatpush.msrb.mxu3 %v3271_v17  ;;  %v737_v17 = vpop.f32.mrf.mxu3  ;;  %v1517_v43 = vand.u32 4294901760, %v1492_v31  ;;  %v1759_v57 = vsub.f32 %v1757_v13, %v1758_v38 }
 0x1f2   :  { %1310 = vmatpush.msrb.mxu0 %v3284_v49  ;;  %1366 = vmatpush.msrb.mxu1 %v3316_v8  ;;  %v738_v49 = vadd.f32 %v737_v17, %v701_v19 }
 0x1f3   :  { %1421 = vmatpush.msrb.mxu2 %v1242_v59  ;;  %1470 = vmatpush.msrb.mxu3 %v3286_v41  ;;  %v1551_v41 = vsub.f32 %v1493_v42, %v3540_v32  ;;  %v1760_v42 = vand.u32 4294901760, %v1759_v57 }
 0x1f4   :  { %1313 = vmatpush.msrb.mxu0 %v3299_v34  ;;  %1368 = vmatpush.msrb.mxu1 %v3327_v53  ;;  %v1496_v34 = vsel %vm1494_vm4, %v738_v49, 0 }
 0x1f5   :  { %1425 = vmatpush.msrb.mxu2 %v1248_v63  ;;  %1472 = vmatpush.msrb.mxu3 %v3301_v62  ;;  %v1557_v62 = vsub.f32 %v1492_v31, %v1517_v43 }
 0x1f6   :  { %1316 = vmatpush.msrb.mxu0 %v3314_v6  ;;  %1370 = vmatpush.msrb.mxu1 %v3398_v21  ;;  %v1552_v6 = vand.u32 4294901760, %v1551_v41 }
 0x1f7   :  { %1429 = vmatpush.msrb.mxu2 %v1254_v3  ;;  %1474 = vmatpush.msrb.mxu3 %v3316_v8  ;;  %v3567_v8 = vand.u32 4294901760, %v1496_v34 }
 0x1f8   :  { %1319 = vmatpush.msrb.mxu0 %v3325_v60  ;;  %1372 = vmatpush.msrb.mxu1 %v3419_v11  ;;  %v1558_v60 = vand.u32 4294901760, %v1557_v62 }
 0x1f9   :  { %1433 = vmatpush.msrb.mxu2 %v1260_v9  ;;  %1476 = vmatpush.msrb.mxu3 %v3327_v53  ;;  %v1520_v53 = vsub.f32 %v1496_v34, %v3567_v8 }
 0x1fa   :  { %1322 = vmatpush.msrb.mxu0 %v3337_v2  ;;  %1374 = vmatpush.msrb.mxu1 %v3432_v45  ;;  %v1553_v2 = vsub.f32 %v1551_v41, %v1552_v6  ;;  %v1559_v59 = vsub.f32 %v1557_v62, %v1558_v60 }
 0x1fb   :  { %1437 = vmatpush.msrb.mxu2 %v1266_v56  ;;  %1478 = vmatpush.msrb.mxu3 %v3398_v21  ;;  %v1521_v63 = vand.u32 4294901760, %v1520_v53 }
 0x1fc   :  { %1325 = vmatpush.msrb.mxu0 %v3347_v15  ;;  %1376 = vmatpush.msrb.mxu1 %v3447_v48  ;;  %v1554_v15 = vand.u32 4294901760, %v1553_v2  ;;  %v1560_v3 = vand.u32 4294901760, %v1559_v59 }
 0x1fd   :  { %1441 = vmatpush.msrb.mxu2 %v1272_v54  ;;  %1480 = vmatpush.msrb.mxu3 %v3419_v11  ;;  %v1522_v21 = vsub.f32 %v1520_v53, %v1521_v63 }
 0x1fe   :  { %1328 = vmatpush.msrb.mxu0 %v3422_v58  ;;  %1378 = vmatpush.msrb.mxu1 %v3462_v18 }
 0x1ff   :  { %1445 = vmatpush.msrb.mxu2 %v1278_v10  ;;  %1482 = vmatpush.msrb.mxu3 %v3432_v45  ;;  %v1523_v11 = vand.u32 4294901760, %v1522_v21 }
 0x200   :  { %1382 = vmatmul.f32.vlgmr.msrb.gmra.mxu1 %v1185_v4  ;;  %1331 = vmatpush.msrb.mxu0 %v3435_v25 }
 0x201   :  { %1449 = vmatpush.msrb.mxu2 %v1284_v52  ;;  %1484 = vmatpush.msrb.mxu3 %v3447_v48 }
 0x202   :  { %1451 = vmatmul.f32.vlgmr.msrb.gmra.mxu2 %v3485_v36  ;;  %1334 = vmatpush.msrb.mxu0 %v3450_v35 }
 0x203   :  { %1486 = vmatpush.msrb.mxu3 %v3462_v18  ;;  %1587 = vmatpush.msra.mxu2 %v1551_v41 }
 0x204   :  { %1488 = vmatmul.f32.vlgmr.msrb.gmra.mxu3 %v3485_v36  ;;  %1337 = vmatpush.msrb.mxu0 %v3465_v55 }
 0x205   :  { %1590 = vmatpush.msra.mxu2 %v1557_v62  ;;  %1617 = vmatpush.msra.mxu3 %v3540_v32 }
 0x206   :  { %1340 = vmatpush.msrb.mxu0 %v3473_v5  ;;  %1555 = vmatpush.msra.mxu1 %v1554_v15 }
 0x207   :  { %1343 = vmatmul.f32.vlgmr.msrb.gmra.mxu0 %v3488_v26  ;;  %1619 = vmatpush.msra.mxu3 %v1517_v43 }
 0x208   :  { %1516 = vmatpush.msra.mxu0 %v3540_v32  ;;  %1561 = vmatpush.msra.mxu1 %v1560_v3 }
 0x209   :  { %1563 = vmatmul.f32.vlgmr.msra.gmra.mxu1 %v3567_v8  ;;  %1716 = vmatpush.msrb.mxu2 %v1715_v29 }
 0x20a   :  { %1593 = vmatmul.f32.vlgmr.msra.gmra.mxu2 %v1520_v53  ;;  %1518 = vmatpush.msra.mxu0 %v1517_v43 }
 0x20b   :  { %1679 = vmatpush.msrb.mxu1 %v3540_v32  ;;  %1718 = vmatpush.msrb.mxu2 %v1717_v24 }
 0x20c   :  { %1650 = vmatpush.msrb.mxu0 %v1552_v6  ;;  %1623 = vmatmul.f32.vlgmr.msra.gmra.mxu3 %v1521_v63 }
 0x20d   :  { %1681 = vmatpush.msrb.mxu1 %v1517_v43  ;;  %1850 = vmatpush.msra.mxu2 %v1752_v37 }
 0x20e   :  { %1654 = vmatpush.msrb.mxu0 %v1558_v60  ;;  %1755 = vmatpush.msrb.mxu3 %v1754_v33 }
 0x20f   :  { %1524 = vmatmul.f32.vlgmr.msra.gmra.mxu0 %v1523_v11  ;;  %1817 = vmatpush.msra.mxu1 %v1715_v29 }
 0x210   :  { %1787 = vmatpush.msra.mxu0 %v1751_v23  ;;  %1854 = vmatpush.msra.mxu2 %v1758_v38 }
 0x211   :  { %1819 = vmatpush.msra.mxu1 %v1717_v24  ;;  %1761 = vmatpush.msrb.mxu3 %v1760_v42 }
 0x212   :  { %1790 = vmatpush.msra.mxu0 %v1757_v13 }
 0x213   :  { %1879 = vmatpush.msra.mxu3 %v1715_v29 }
 0x215   :  { %1881 = vmatpush.msra.mxu3 %v1717_v24 }
 0x25a   :  { %v949_v9 = vpop.f32.mrf.mxu1 }
 0x262   :  { %v848_v58 = vpop.f32.mrf.mxu0  ;;  %v1003_v25 = vpop.f32.mrf.mxu2 }
 0x263   :  { %v950_v45 = vadd.f32 %v949_v9, %v848_v58  ;;  %v1148_v55 = vpop.f32.mrf.mxu1 }
 0x264   :  { %v1042_v48 = vpop.f32.mrf.mxu3 }
 0x265   :  { %v1004_v56 = vadd.f32 %v1003_v25, %v950_v45 }
 0x267   :  { %v1043_v54 = vadd.f32 %v1042_v48, %v1004_v56 }
 0x26b   :  { %v1189_v5 = vpop.f32.mrf.mxu2 }
 0x26c   :  { %v1111_v35 = vpop.f32.mrf.mxu0 }
 0x26d   :  { %v1112_v18 = vadd.f32 %v1111_v35, %v1043_v54 }
 0x26e   :  { %v1290_v36 = vpop.f32.mrf.mxu3 }
 0x26f   :  { %v1149_v10 = vadd.f32 %v1148_v55, %v1112_v18 }
 0x271   :  { %v1190_v52 = vadd.f32 %v1189_v5, %v1149_v10 }
 0x273   :  { %v1291_v26 = vadd.f32 %v1290_v36, %v1190_v52 }
 0x27d   :  { %v1383_v47 = vpop.f32.mrf.mxu1 }
 0x284   :  { %v1344_v4 = vpop.f32.mrf.mxu0 }
 0x285   :  { %v1345_v1 = vadd.f32 %v1344_v4, %v1291_v26  ;;  %v1452_v7 = vpop.f32.mrf.mxu2 }
 0x286   :  { %v1564_v28 = vpop.f32.mrf.mxu1 }
 0x287   :  { %v1384_v40 = vadd.f32 %v1383_v47, %v1345_v1  ;;  %v1489_v50 = vpop.f32.mrf.mxu3 }
 0x289   :  { %v1453_v16 = vadd.f32 %v1452_v7, %v1384_v40 }
 0x28b   :  { %v1490_v22 = vadd.f32 %v1489_v50, %v1453_v16 }
 0x28c   :  { %v1525_v0 = vpop.f32.mrf.mxu0 }
 0x28d   :  { %v1499_v44 = vsel %vm1494_vm4, %v1490_v22, 0  ;;  %v1565_v30 = vadd.f32 %v1564_v28, %v1525_v0  ;;  %v1594_v32 = vpop.f32.mrf.mxu2 }
 0x28e   :  { %v1527_v20 = vand.u32 4294901760, %v1499_v44 }
 0x28f   :  { %v1595_v17 = vadd.f32 %v1594_v32, %v1565_v30  ;;  %v1624_v43 = vpop.f32.mrf.mxu3 }
 0x290   :  { %v1528_v61 = vsub.f32 %v1499_v44, %v1527_v20  ;;  %1567 = vmatmul.f32.gmra.mxu1 %v1527_v20 }
 0x291   :  { %v1625_v49 = vadd.f32 %v1624_v43, %v1595_v17  ;;  %v1914_v43 = vld [vmem:[%s3633_s3 + $0x18] sm:$0xff] }
 0x292   :  { %1598 = vmatmul.f32.gmra.mxu2 %v1528_v61  ;;  %v1529_v12 = vand.u32 4294901760, %v1528_v61 }
 0x294   :  { %1629 = vmatmul.f32.gmra.mxu3 %v1529_v12  ;;  %v1530_v39 = vsub.f32 %v1528_v61, %v1529_v12 }
 0x296   :  { %v1531_v14 = vand.u32 4294901760, %v1530_v39 }
 0x298   :  { %1532 = vmatmul.f32.gmra.mxu0 %v1531_v14  ;;  %1683 = vmatmul.f32.vlgmr.msrb.gmra.mxu1 %v3567_v8  ;;  %v1911_v14 = vld [vmem:[%s3633_s3] sm:$0xff] }
 0x299   :  { %v1934_v29 = vand.u32 4294901760, %v1911_v14 }
 0x29b   :  { %v1966_v37 = vsub.f32 %v1911_v14, %v1934_v29  ;;  %v2266_v14 = vld [vmem:[%s3630_s0] sm:$0xff] }
 0x29d   :  { %v1967_v57 = vand.u32 4294901760, %v1966_v37 }
 0x2a0   :  { %1656 = vmatmul.f32.vlgmr.msrb.gmra.mxu0 %v3567_v8  ;;  %1687 = vmatmul.f32.gmra.mxu1 %v1527_v20 }
 0x2a8   :  { %1660 = vmatmul.f32.gmra.mxu0 %v1527_v20  ;;  %v1913_v20 = vld [vmem:[%s3633_s3 + $0x10] sm:$0xff] }
 0x2a9   :  { %v1932_v12 = vand.u32 4294901760, %v1913_v20 }
 0x2ab   :  { %v1960_v27 = vsub.f32 %v1913_v20, %v1932_v12  ;;  %1933 = vmatpush.msrb.mxu0 %v1932_v12 }
 0x2ad   :  { %v1961_v24 = vand.u32 4294901760, %v1960_v27  ;;  %1935 = vmatpush.msrb.mxu0 %v1934_v29 }
 0x2af   :  { %v1962_v33 = vsub.f32 %v1960_v27, %v1961_v24 }
 0x2b1   :  { %v1963_v0 = vand.u32 4294901760, %v1962_v33 }
 0x2b3   :  { %1964 = vmatpush.msrb.mxu1 %v1963_v0 }
 0x30d   :  { %v1568_v31 = vpop.f32.mrf.mxu1 }
 0x315   :  { %v1533_v19 = vpop.f32.mrf.mxu0  ;;  %v1684_v34 = vpop.f32.mrf.mxu1 }
 0x316   :  { %v1569_v41 = vadd.f32 %v1568_v31, %v1533_v19  ;;  %v1599_v8 = vpop.f32.mrf.mxu2  ;;  %v1968_v31 = vsub.f32 %v1966_v37, %v1967_v57 }
 0x317   :  { %v1630_v59 = vpop.f32.mrf.mxu3 }
 0x318   :  { %v1600_v60 = vadd.f32 %v1599_v8, %v1569_v41  ;;  %v1969_v19 = vand.u32 4294901760, %v1968_v31 }
 0x31a   :  { %v1631_v15 = vadd.f32 %v1630_v59, %v1600_v60  ;;  %1970 = vmatpush.msrb.mxu1 %v1969_v19 }
 0x31d   :  { %v1657_v62 = vpop.f32.mrf.mxu0  ;;  %v1688_v9 = vpop.f32.mrf.mxu1 }
 0x31e   :  { %v1658_v6 = vadd.f32 %v1657_v62, %v1625_v49  ;;  %v2091_v49 = vand.u32 4294901760, %v1914_v43 }
 0x320   :  { %v1685_v2 = vadd.f32 %v1684_v34, %v1658_v6  ;;  %v1912_v34 = vld [vmem:[%s3633_s3 + $0x8] sm:$0xff]  ;;  %v2119_v62 = vsub.f32 %v1914_v43, %v2091_v49 }
 0x321   :  { %v2093_v6 = vand.u32 4294901760, %v1912_v34 }
 0x322   :  { %v1691_v53 = vmax.f32 %v1685_v2, 0.0  ;;  %v2120_v8 = vand.u32 4294901760, %v2119_v62 }
 0x323   :  { %v2125_v60 = vsub.f32 %v1912_v34, %v2093_v6 }
 0x324   :  { %v1696_v63 = vsel %vm1494_vm4, %v1691_v53, 0  ;;  %v2121_v2 = vsub.f32 %v2119_v62, %v2120_v8 }
 0x325   :  { %v1719_v3 = vand.u32 4294901760, %v1696_v63  ;;  %v1661_v21 = vpop.f32.mrf.mxu0  ;;  %v2126_v53 = vand.u32 4294901760, %v2125_v60 }
 0x326   :  { %v1662_v11 = vadd.f32 %v1661_v21, %v1631_v15  ;;  %v2122_v59 = vand.u32 4294901760, %v2121_v2 }
 0x327   :  { %v1720_v58 = vsub.f32 %v1696_v63, %v1719_v3  ;;  %1763 = vmatmul.f32.vlgmr.msrb.gmra.mxu3 %v1719_v3  ;;  %v2127_v15 = vsub.f32 %v2125_v60, %v2126_v53 }
 0x328   :  { %v1689_v45 = vadd.f32 %v1688_v9, %v1662_v11  ;;  %2017 = vmatpush.msrb.mxu3 %v1932_v12 }
 0x329   :  { %1793 = vmatmul.f32.vlgmr.msra.gmra.mxu0 %v1720_v58  ;;  %v1721_v25 = vand.u32 4294901760, %v1720_v58  ;;  %v2128_v21 = vand.u32 4294901760, %v2127_v15 }
 0x32a   :  { %v1692_v56 = vmax.f32 %v1689_v45, 0.0  ;;  %2019 = vmatpush.msrb.mxu3 %v1934_v29  ;;  %2044 = vmatpush.msra.mxu0 %v1961_v24 }
 0x32b   :  { %1823 = vmatmul.f32.vlgmr.msra.gmra.mxu1 %v1721_v25  ;;  %v1722_v48 = vsub.f32 %v1720_v58, %v1721_v25 }
 0x32c   :  { %v1699_v35 = vsel %vm1494_vm4, %v1692_v56, 0  ;;  %2048 = vmatpush.msra.mxu0 %v1967_v57  ;;  %2069 = vmatpush.msra.mxu1 %v1932_v12  ;;  %v2267_v57 = vld [vmem:[%s3630_s0 + $0x8] sm:$0xff] }
 0x32d   :  { %v1727_v54 = vand.u32 4294901760, %v1699_v35  ;;  %v1723_v18 = vand.u32 4294901760, %v1722_v48 }
 0x32e   :  { %2071 = vmatpush.msra.mxu1 %v1934_v29 }
 0x32f   :  { %1724 = vmatmul.f32.vlgmr.msrb.gmra.mxu2 %v1723_v18  ;;  %1767 = vmatmul.f32.gmra.mxu3 %v1727_v54  ;;  %v1728_v55 = vsub.f32 %v1699_v35, %v1727_v54 }
 0x330   :  { %1992 = vmatpush.msrb.mxu2 %v1960_v27 }
 0x331   :  { %1798 = vmatmul.f32.gmra.mxu0 %v1728_v55  ;;  %v1729_v10 = vand.u32 4294901760, %v1728_v55 }
 0x332   :  { %1995 = vmatpush.msrb.mxu2 %v1966_v37 }
 0x333   :  { %1829 = vmatmul.f32.gmra.mxu1 %v1729_v10  ;;  %v1730_v5 = vsub.f32 %v1728_v55, %v1729_v10 }
 0x335   :  { %v1731_v52 = vand.u32 4294901760, %v1730_v5 }
 0x337   :  { %1732 = vmatmul.f32.gmra.mxu2 %v1731_v52  ;;  %1883 = vmatmul.f32.vlgmr.msra.gmra.mxu3 %v1719_v3 }
 0x338   :  { %2123 = vmatpush.msra.mxu3 %v2122_v59 }
 0x33a   :  { %2129 = vmatpush.msra.mxu3 %v2128_v21 }
 0x33f   :  { %1856 = vmatmul.f32.vlgmr.msra.gmra.mxu2 %v1719_v3  ;;  %1887 = vmatmul.f32.gmra.mxu3 %v1727_v54 }
 0x340   :  { %2092 = vmatpush.msra.mxu2 %v2091_v49 }
 0x342   :  { %2094 = vmatpush.msra.mxu2 %v2093_v6 }
 0x347   :  { %1860 = vmatmul.f32.gmra.mxu2 %v1727_v54 }
 0x3a6   :  { %v1794_v1 = vpop.f32.mrf.mxu0 }
 0x3a8   :  { %v1824_v40 = vpop.f32.mrf.mxu1 }
 0x3aa   :  { %v1764_v36 = vpop.f32.mrf.mxu3 }
 0x3ae   :  { %v1799_v61 = vpop.f32.mrf.mxu0 }
 0x3b0   :  { %v1830_v23 = vpop.f32.mrf.mxu1 }
 0x3b2   :  { %v1725_v26 = vpop.f32.mrf.mxu2  ;;  %v1768_v4 = vpop.f32.mrf.mxu3 }
 0x3b3   :  { %v1765_v7 = vadd.f32 %v1764_v36, %v1725_v26 }
 0x3b5   :  { %v1795_v44 = vadd.f32 %v1794_v1, %v1765_v7 }
 0x3b7   :  { %v1825_v51 = vadd.f32 %v1824_v40, %v1795_v44 }
 0x3ba   :  { %v1733_v47 = vpop.f32.mrf.mxu2  ;;  %v1884_v50 = vpop.f32.mrf.mxu3 }
 0x3bb   :  { %v1769_v16 = vadd.f32 %v1768_v4, %v1733_v47 }
 0x3bd   :  { %v1800_v39 = vadd.f32 %v1799_v61, %v1769_v16 }
 0x3bf   :  { %v1831_v46 = vadd.f32 %v1830_v23, %v1800_v39 }
 0x3c2   :  { %v1857_v22 = vpop.f32.mrf.mxu2  ;;  %v1888_v28 = vpop.f32.mrf.mxu3 }
 0x3c3   :  { %v1858_v13 = vadd.f32 %v1857_v22, %v1825_v51 }
 0x3c5   :  { %v1885_v30 = vadd.f32 %v1884_v50, %v1858_v13 }
 0x3ca   :  { %v1861_v38 = vpop.f32.mrf.mxu2 }
 0x3cb   :  { %v1862_v42 = vadd.f32 %v1861_v38, %v1831_v46 }
 0x3cd   :  { %v1889_v32 = vadd.f32 %v1888_v28, %v1862_v42 }
 0x3cf   :  { %v1891_v17 = vadd.f32 %v1889_v32, %v1885_v30 }
 0x3d1   :  { %v2256_v41 = vmul.f32 -1.442695, %v1891_v17 }
 0x3d3   :  { %2262 = vpow2.f32 %v2256_v41 }
 0x3d9   :  { %v2263_v63 = vpop.eup %2262 }
 0x3da   :  { %v1895_v3 = vadd.f32 1.0, %v2263_v63 }
 0x3dc   :  { %2264 = vrcp.f32 %v1895_v3  ;;  %v1907_v45 = vand.u32 2147483648, %v1895_v3  ;;  %v1905_v56 = vand.u32 2147483647, %v1895_v3  ;;  %vm1901_vm6 = vweird.f32 %v1895_v3 }
 0x3de   :  { %v1908_v35 = vor.u32 1.1754944e-38, %v1907_v45  ;;  %vm1906_vm8 = vcmp.eq.f32.partialorder %v1905_v56, 8.507059e+37 }
 0x3e2   :  { %v2265_v11 = vpop.eup %2264 }
 0x3e3   :  { %v1897_v58 = vmul.f32 %v2265_v11, %v1895_v3  ;;  %vm1902_vm5 = vweird.f32 %v2265_v11 }
 0x3e4   :  { %vm1903_vm7 = vmor %vm1901_vm6, %vm1902_vm5 }
 0x3e5   :  { %v1898_v9 = vsub.f32 1.0, %v1897_v58 }
 0x3e7   :  { %v1899_v25 = vmul.f32 %v2265_v11, %v1898_v9 }
 0x3e9   :  { %v1900_v48 = vadd.f32 %v2265_v11, %v1899_v25 }
 0x3eb   :  { %v1904_v54 = vsel %vm1903_vm7, %v2265_v11, %v1900_v48 }
 0x3ec   :  { %v1909_v18 = vsel %vm1906_vm8, %v1908_v35, %v1904_v54 }
 0x3ed   :  { %v1916_v55 = vsel %vm1494_vm4, %v1909_v18, 0 }
 0x3ee   :  { %v1936_v10 = vand.u32 4294901760, %v1916_v55 }
 0x3f0   :  { %1972 = vmatmul.f32.vlgmr.msrb.gmra.mxu1 %v1936_v10  ;;  %v1937_v5 = vsub.f32 %v1916_v55, %v1936_v10 }
 0x3f1   :  { %2176 = vmatpush.msrb.mxu1 %v2091_v49 }
 0x3f2   :  { %1998 = vmatmul.f32.vlgmr.msrb.gmra.mxu2 %v1937_v5  ;;  %v1938_v52 = vand.u32 4294901760, %v1937_v5 }
 0x3f3   :  { %2203 = vmatpush.msrb.mxu2 %v2120_v8  ;;  %2178 = vmatpush.msrb.mxu1 %v2093_v6 }
 0x3f4   :  { %2023 = vmatmul.f32.vlgmr.msrb.gmra.mxu3 %v1938_v52  ;;  %v1939_v36 = vsub.f32 %v1937_v5, %v1938_v52 }
 0x3f5   :  { %2228 = vmatpush.msrb.mxu3 %v2091_v49  ;;  %2207 = vmatpush.msrb.mxu2 %v2126_v53 }
 0x3f6   :  { %v1940_v26 = vand.u32 4294901760, %v1939_v36 }
 0x3f7   :  { %2230 = vmatpush.msrb.mxu3 %v2093_v6 }
 0x3f8   :  { %1941 = vmatmul.f32.vlgmr.msrb.gmra.mxu0 %v1940_v26  ;;  %2073 = vmatmul.f32.vlgmr.msra.gmra.mxu1 %v1936_v10 }
 0x3f9   :  { %2151 = vmatpush.msrb.mxu0 %v2119_v62 }
 0x3fa   :  { %2100 = vmatmul.f32.vlgmr.msra.gmra.mxu2 %v1940_v26 }
 0x3fb   :  { %2154 = vmatpush.msrb.mxu0 %v2125_v60 }
 0x3fc   :  { %2131 = vmatmul.f32.vlgmr.msra.gmra.mxu3 %v1936_v10 }
 0x400   :  { %2050 = vmatmul.f32.vlgmr.msra.gmra.mxu0 %v1936_v10  ;;  %2182 = vmatmul.f32.vlgmr.msrb.gmra.mxu1 %v1938_v52 }
 0x402   :  { %2209 = vmatmul.f32.vlgmr.msrb.gmra.mxu2 %v1936_v10 }
 0x404   :  { %2232 = vmatmul.f32.vlgmr.msrb.gmra.mxu3 %v1936_v10 }
 0x408   :  { %2157 = vmatmul.f32.vlgmr.msrb.gmra.mxu0 %v1937_v5 }
 0x46d   :  { %v1973_v4 = vpop.f32.mrf.mxu1 }
 0x475   :  { %v1942_v1 = vpop.f32.mrf.mxu0  ;;  %v1999_v47 = vpop.f32.mrf.mxu2 }
 0x476   :  { %v1974_v40 = vadd.f32 %v1973_v4, %v1942_v1  ;;  %v2074_v22 = vpop.f32.mrf.mxu1 }
 0x477   :  { %v2024_v7 = vpop.f32.mrf.mxu3 }
 0x478   :  { %v2000_v16 = vadd.f32 %v1999_v47, %v1974_v40 }
 0x47a   :  { %v2025_v50 = vadd.f32 %v2024_v7, %v2000_v16 }
 0x47d   :  { %v2051_v44 = vpop.f32.mrf.mxu0  ;;  %v2101_v61 = vpop.f32.mrf.mxu2 }
 0x47e   :  { %v2052_v20 = vadd.f32 %v2051_v44, %v2025_v50  ;;  %v2183_v24 = vpop.f32.mrf.mxu1 }
 0x47f   :  { %v2132_v39 = vpop.f32.mrf.mxu3 }
 0x480   :  { %v2075_v12 = vadd.f32 %v2074_v22, %v2052_v20  ;;  %v2133_v29 = vadd.f32 %v2132_v39, %v2101_v61 }
 0x482   :  { %v2236_v27 = vmul.f32 %v2266_v14, %v2075_v12 }
 0x484   :  { %2238 = vst [vmem:[#allocation2] sm:$0xff] %v2236_v27 }
 0x485   :  { %v2158_v51 = vpop.f32.mrf.mxu0  ;;  %v2210_v13 = vpop.f32.mrf.mxu2 }
 0x486   :  { %v2159_v23 = vadd.f32 %v2158_v51, %v2133_v29 }
 0x487   :  { %v2233_v38 = vpop.f32.mrf.mxu3 }
 0x488   :  { %v2184_v37 = vadd.f32 %v2183_v24, %v2159_v23 }
 0x48a   :  { %v2211_v46 = vadd.f32 %v2210_v13, %v2184_v37 }
 0x48c   :  { %v2234_v33 = vadd.f32 %v2233_v38, %v2211_v46 }
 0x48e   :  { %v2237_v42 = vmul.f32 %v2267_v57, %v2234_v33 }
 0x490   :  { %2239 = vst [vmem:[#allocation2 + $0x8] sm:$0xff] %v2237_v42 }
 0x491   :  { %2250 = dma.vmem_to_hbm [thread:$0]  %s2246_s24, 256, %s2248_s27, [#allocation3]  }
 0x492   :  { %2292 = dma.done.wait [#allocation3], 256  }
 0x493   :  { %2293 = vsyncadd [#allocation3], 4294967040 }
 0x494   :  { %2255 = vsyncpa [#allocation3], 1 }

</bundles_post_ra>
